<compile_context>
chip_gen: v7x
topology: tpu7x:2x2x1
jax: 0.10.0
libtpu: 0.0.40
codegen_flags: <defaults>
</compile_context>

<pallas_src>
import math
import jax
import jax.numpy as jnp
from jax.experimental import pallas as pl
from jax.experimental.pallas import tpu as pltpu

_INV_SQRT2 = 0.7071067811865476


def _gelu_exact(h):
    # Exact erf-form GELU (torch.nn.GELU default), computed in f32.
    return 0.5 * h * (1.0 + jax.lax.erf(h * _INV_SQRT2))


# ---------------------------------------------------------------------------
# Kernels
# ---------------------------------------------------------------------------
def mlp_kernel_fused(x_ref, w1_ref, b1_ref, w2_ref, b2_ref, o_ref):
    """1-D grid over token tiles; full W1/W2 resident in VMEM."""
    x = x_ref[...]                                                    # (tm, C_in) bf16
    h = jnp.dot(x, w1_ref[...], preferred_element_type=jnp.float32)  # f32 acc
    h = _gelu_exact(h + b1_ref[...])
    y = jnp.dot(h.astype(w2_ref.dtype), w2_ref[...],
                preferred_element_type=jnp.float32) + b2_ref[...]
    o_ref[...] = y.astype(o_ref.dtype)


def mlp_kernel_tiled_f32out(x_ref, w1_ref, b1_ref, w2_ref, b2_ref, o_ref):
    """2-D grid (tokens, hidden); f32 output block doubles as the accumulator."""
    h_idx = pl.program_id(1)

    @pl.when(h_idx == 0)
    def _():
        # Initialize with b2 so the bias is added exactly once.
        o_ref[...] = jnp.broadcast_to(b2_ref[...], o_ref.shape).astype(o_ref.dtype)

    x = x_ref[...]
    h = jnp.dot(x, w1_ref[...], preferred_element_type=jnp.float32) + b1_ref[...]
    h = _gelu_exact(h)
    o_ref[...] += jnp.dot(h.astype(w2_ref.dtype), w2_ref[...],
                          preferred_element_type=jnp.float32)


def mlp_kernel_tiled_scratch(x_ref, w1_ref, b1_ref, w2_ref, b2_ref, o_ref, acc_ref):
    """2-D grid (tokens, hidden); f32 scratch accumulator for narrow output dtypes."""
    h_idx = pl.program_id(1)

    @pl.when(h_idx == 0)
    def _():
        acc_ref[...] = jnp.zeros_like(acc_ref)

    x = x_ref[...]
    h = jnp.dot(x, w1_ref[...], preferred_element_type=jnp.float32) + b1_ref[...]
    h = _gelu_exact(h)
    acc_ref[...] += jnp.dot(h.astype(w2_ref.dtype), w2_ref[...],
                            preferred_element_type=jnp.float32)

    @pl.when(h_idx == pl.num_programs(1) - 1)
    def _():
        o_ref[...] = (acc_ref[...] + b2_ref[...]).astype(o_ref.dtype)


# ---------------------------------------------------------------------------
# Sizing helpers
# ---------------------------------------------------------------------------
def _round_up(x, m):
    return ((x + m - 1) // m) * m


def _vmem_budget_bytes():
    """~80% of physical VMEM: ~51 MiB on v7x (64 MiB), ~102 MiB on v5e/v6e (128 MiB)."""
    try:
        cap = int(pltpu.get_tpu_info().vmem_capacity_bytes)
        return max(16 * 1024 * 1024, int(cap * 0.8))
    except Exception:
        # Conservative default that fits every generation, incl. v7x.
        return 48 * 1024 * 1024


def _pick_hidden_tile(c_hid):
    # Prefer >=256-wide hidden tiles: full MXU width on v6e/v7x (2x256x256);
    # 256 is also a clean multiple of v5e's 128-wide MXU.
    for cand in (512, 256, 128):
        if c_hid % cand == 0:
            return cand
    return c_hid  # odd hidden dims: keep the whole thing in one block


def _choose_tm(M, budget, footprint_fn):
    """Largest token tile (multiple of 16 for bf16 packing) fitting the VMEM
    budget, but keep >=2 token tiles when M allows so both v7x TensorCores get
    work on the single 'parallel' axis."""
    if M >= 32:
        upper = _round_up(pl.cdiv(M, 2), 16)
    else:
        upper = _round_up(max(M, 1), 16)
    for tm in (1024, 768, 512, 384, 256, 192, 128, 96, 64, 48, 32, 16):
        if tm > upper:
            continue
        if footprint_fn(tm) <= budget:
            return tm
    return 16


# ---------------------------------------------------------------------------
# Wrapper
# ---------------------------------------------------------------------------
def mlp_forward(x, w1, b1, w2, b2, *, compute_dtype=jnp.bfloat16):
    """x: (B, N, C_in) -> (B, N, C_out).
    w1: (C_in, C_hid), b1: (C_hid,), w2: (C_hid, C_out), b2: (C_out,)."""
    B, N, C_in = x.shape
    C_hid = w1.shape[1]
    C_out = w2.shape[1]
    M = B * N
    out_dtype = x.dtype

    budget = _vmem_budget_bytes()

    # bf16 compute path (f32 accumulation inside the kernel); biases stay f32.
    xc = x.reshape(M, C_in).astype(compute_dtype)
    w1c = w1.astype(compute_dtype)
    w2c = w2.astype(compute_dtype)
    b1_2d = b1.reshape(1, C_hid).astype(jnp.float32)
    b2_2d = b2.reshape(1, C_out).astype(jnp.float32)

    cb = jnp.dtype(compute_dtype).itemsize
    ob = jnp.dtype(out_dtype).itemsize

    def fused_footprint(tm):
        return (2 * tm * C_in * cb                 # x tiles (double buffered)
                + 2 * tm * C_out * ob              # out tiles
                + 2 * C_in * C_hid * cb            # W1 (whole)
                + 2 * C_hid * C_out * cb           # W2 (whole)
                + 2 * (C_hid + C_out) * 4          # biases
                + tm * C_hid * (4 + cb))           # f32 intermediate + bf16 copy

    th = _pick_hidden_tile(C_hid)

    def tiled_footprint(tm):
        return (2 * tm * C_in * cb
                + 2 * tm * C_out * ob
                + 2 * C_in * th * cb               # W1 column block
                + 2 * th * C_out * cb              # W2 row block
                + 2 * (th + C_out) * 4
                + tm * th * (4 + cb)               # intermediate slice
                + tm * C_out * 4)                  # f32 accumulator

    use_fused = fused_footprint(16) <= budget
    footprint_fn = fused_footprint if use_fused else tiled_footprint
    tm = _choose_tm(M, budget, footprint_fn)

    Mp = pl.cdiv(M, tm) * tm
    if Mp != M:
        xc = jnp.pad(xc, ((0, Mp - M), (0, 0)))    # padded rows computed & dropped

    vmem_limit = int(budget)

    if use_fused:
        # Single matmul pass per token tile; hidden axis collapsed.
        out = pl.pallas_call(
            mlp_kernel_fused,
            out_shape=jax.ShapeDtypeStruct((Mp, C_out), out_dtype),
            grid_spec=pltpu.PrefetchScalarGridSpec(
                num_scalar_prefetch=0,
                grid=(Mp // tm,),
                in_specs=[
                    pl.BlockSpec((tm, C_in), lambda i: (i, 0)),       # x tokens
                    pl.BlockSpec((C_in, C_hid), lambda i: (0, 0)),    # W1 (whole)
                    pl.BlockSpec((1, C_hid), lambda i: (0, 0)),       # b1
                    pl.BlockSpec((C_hid, C_out), lambda i: (0, 0)),   # W2 (whole)
                    pl.BlockSpec((1, C_out), lambda i: (0, 0)),       # b2
                ],
                out_specs=pl.BlockSpec((tm, C_out), lambda i: (i, 0)),
            ),
            compiler_params=pltpu.CompilerParams(
                dimension_semantics=("parallel",),
                vmem_limit_bytes=vmem_limit,
            ),
        )(xc, w1c, b1_2d, w2c, b2_2d)
    else:
        # Hidden-tiled fallback for widths whose weights exceed the VMEM budget.
        assert C_hid % th == 0
        if out_dtype == jnp.float32:
            kernel = mlp_kernel_tiled_f32out
            scratch = []
        else:
            kernel = mlp_kernel_tiled_scratch
            scratch = [pltpu.VMEM((tm, C_out), jnp.float32)]
        out = pl.pallas_call(
            kernel,
            out_shape=jax.ShapeDtypeStruct((Mp, C_out), out_dtype),
            grid_spec=pltpu.PrefetchScalarGridSpec(
                num_scalar_prefetch=0,
                grid=(Mp // tm, C_hid // th),          # reduction axis last
                in_specs=[
                    pl.BlockSpec((tm, C_in), lambda i, h: (i, 0)),    # x tokens
                    pl.BlockSpec((C_in, th), lambda i, h: (0, h)),    # W1 col block
                    pl.BlockSpec((1, th), lambda i, h: (0, h)),       # b1 block
                    pl.BlockSpec((th, C_out), lambda i, h: (h, 0)),   # W2 row block
                    pl.BlockSpec((1, C_out), lambda i, h: (0, 0)),    # b2
                ],
                out_specs=pl.BlockSpec((tm, C_out), lambda i, h: (i, 0)),
                scratch_shapes=scratch,
            ),
            compiler_params=pltpu.CompilerParams(
                dimension_semantics=("parallel", "arbitrary"),
                vmem_limit_bytes=vmem_limit,
            ),
        )(xc, w1c, b1_2d, w2c, b2_2d)

    if Mp != M:
        out = out[:M]
    return out.reshape(B, N, C_out)


def init_params(key, embedding_dim, mlp_dim):
    """Deterministic init mimicking nn.Linear default (uniform +/- 1/sqrt(fan_in))."""
    k1, k2, k3, k4 = jax.random.split(key, 4)
    lim1 = 1.0 / math.sqrt(embedding_dim)
    lim2 = 1.0 / math.sqrt(mlp_dim)
    w1 = jax.random.uniform(k1, (embedding_dim, mlp_dim), jnp.float32, -lim1, lim1)
    b1 = jax.random.uniform(k2, (mlp_dim,), jnp.float32, -lim1, lim1)
    w2 = jax.random.uniform(k3, (mlp_dim, embedding_dim), jnp.float32, -lim2, lim2)
    b2 = jax.random.uniform(k4, (embedding_dim,), jnp.float32, -lim2, lim2)
    return w1, b1, w2, b2


if __name__ == "__main__":
    # Small, lane-dense shapes: embedding_dim=128, mlp_dim=256.
    # Weights easily fit VMEM -> fused 1-D path; M=512 tokens -> 2 token tiles.
    B, N, C_emb, C_mlp = 2, 256, 128, 256

    key = jax.random.PRNGKey(0)
    kx, kp = jax.random.split(key)
    x = jax.random.normal(kx, (B, N, C_emb), dtype=jnp.float32)
    w1, b1, w2, b2 = init_params(kp, C_emb, C_mlp)

    y = mlp_forward(x, w1, b1, w2, b2)
    y = jax.block_until_ready(y)

    # Pure-JAX f32 reference (exact-erf GELU, matching torch.nn.GELU).
    # Tolerance is loosened because the kernel runs its matmuls in bf16
    # (f32 accumulation), per the performance review.
    h_ref = x.reshape(-1, C_emb) @ w1 + b1
    h_ref = 0.5 * h_ref * (1.0 + jax.lax.erf(h_ref / math.sqrt(2.0)))
    y_ref = (h_ref @ w2 + b2).reshape(B, N, C_emb)
    assert jnp.allclose(y, y_ref, atol=2e-2, rtol=2e-2), "mismatch vs reference"

    print("KERNEL_OK")
</pallas_src>

<mosaic_0001>
module attributes {stable_mosaic.version = 11 : i64} {
  func.func @mlp_kernel_fused(%arg0: i32, %arg1: memref<256x128xbf16, #tpu.memory_space<vmem>>, %arg2: memref<128x256xbf16, #tpu.memory_space<vmem>>, %arg3: memref<1x256xf32, #tpu.memory_space<vmem>>, %arg4: memref<256x128xbf16, #tpu.memory_space<vmem>>, %arg5: memref<1x128xf32, #tpu.memory_space<vmem>>, %arg6: memref<256x128xf32, #tpu.memory_space<vmem>>) attributes {dimension_semantics = [#tpu.dimension_semantics<parallel>], iteration_bounds = array<i64: 2>, scalar_prefetch = 0 : i64, scratch_operands = 0 : i64, tpu.core_type = #tpu.core_type<tc>, window_params = [{transform_indices = @transform_0, window_bounds = array<i64: 256, 128>}, {pipeline_mode = #tpu.pipeline_mode<synchronous>, transform_indices = @transform_1, window_bounds = array<i64: 128, 256>}, {pipeline_mode = #tpu.pipeline_mode<synchronous>, transform_indices = @transform_2, window_bounds = array<i64: 1, 256>}, {pipeline_mode = #tpu.pipeline_mode<synchronous>, transform_indices = @transform_3, window_bounds = array<i64: 256, 128>}, {pipeline_mode = #tpu.pipeline_mode<synchronous>, transform_indices = @transform_4, window_bounds = array<i64: 1, 128>}, {transform_indices = @transform_5, window_bounds = array<i64: 256, 128>}]} {
    %c0 = arith.constant 0 : index
    %c0_0 = arith.constant 0 : index
    %0 = vector.load %arg1[%c0, %c0_0] : memref<256x128xbf16, #tpu.memory_space<vmem>>, vector<256x128xbf16>
    %c0_1 = arith.constant 0 : index
    %c0_2 = arith.constant 0 : index
    %1 = vector.load %arg2[%c0_1, %c0_2] : memref<128x256xbf16, #tpu.memory_space<vmem>>, vector<128x256xbf16>
    %cst = arith.constant dense<0.000000e+00> : vector<256x256xf32>
    %2 = tpu.matmul %0, %1, %cst {dimension_numbers = #tpu.dot_dimension_numbers<[1], [0], [0], [1], [0, 0, 1, 1], [], []>} : vector<256x128xbf16>, vector<128x256xbf16>, vector<256x256xf32> -> vector<256x256xf32>
    %c0_3 = arith.constant 0 : index
    %c0_4 = arith.constant 0 : index
    %3 = vector.load %arg3[%c0_3, %c0_4] : memref<1x256xf32, #tpu.memory_space<vmem>>, vector<1x256xf32>
    %4 = vector.broadcast %3 : vector<1x256xf32> to vector<256x256xf32>
    %5 = arith.addf %2, %4 : vector<256x256xf32>
    %cst_5 = arith.constant 5.000000e-01 : f32
    %6 = vector.broadcast %cst_5 : f32 to vector<256x256xf32>
    %7 = arith.mulf %6, %5 : vector<256x256xf32>
    %cst_6 = arith.constant 0.707106769 : f32
    %8 = vector.broadcast %cst_6 : f32 to vector<256x256xf32>
    %9 = arith.mulf %5, %8 : vector<256x256xf32>
    %10 = math.erf %9 : vector<256x256xf32>
    %cst_7 = arith.constant 1.000000e+00 : f32
    %11 = vector.broadcast %cst_7 : f32 to vector<256x256xf32>
    %12 = arith.addf %11, %10 : vector<256x256xf32>
    %13 = arith.mulf %7, %12 : vector<256x256xf32>
    %14 = arith.truncf %13 : vector<256x256xf32> to vector<256x256xbf16>
    %c0_8 = arith.constant 0 : index
    %c0_9 = arith.constant 0 : index
    %15 = vector.load %arg4[%c0_8, %c0_9] : memref<256x128xbf16, #tpu.memory_space<vmem>>, vector<256x128xbf16>
    %cst_10 = arith.constant dense<0.000000e+00> : vector<256x128xf32>
    %16 = tpu.matmul %14, %15, %cst_10 {dimension_numbers = #tpu.dot_dimension_numbers<[1], [0], [0], [1], [0, 0, 1, 1], [], []>} : vector<256x256xbf16>, vector<256x128xbf16>, vector<256x128xf32> -> vector<256x128xf32>
    %c0_11 = arith.constant 0 : index
    %c0_12 = arith.constant 0 : index
    %17 = vector.load %arg5[%c0_11, %c0_12] : memref<1x128xf32, #tpu.memory_space<vmem>>, vector<1x128xf32>
    %18 = vector.broadcast %17 : vector<1x128xf32> to vector<256x128xf32>
    %19 = arith.addf %16, %18 : vector<256x128xf32>
    %c0_13 = arith.constant 0 : index
    %c0_14 = arith.constant 0 : index
    %20 = vector.load %arg6[%c0_13, %c0_14] : memref<256x128xf32, #tpu.memory_space<vmem>>, vector<256x128xf32>
    tpu.vector_store %arg6[%c0_13, %c0_14], %19 {strides = array<i32>} : memref<256x128xf32, #tpu.memory_space<vmem>>, vector<256x128xf32>,
    return
  }
  func.func @transform_0(%arg0: i32) -> (i32, i32) {
    %c0_i32 = arith.constant 0 : i32
    %c0_i32_0 = arith.constant 0 : i32
    return %arg0, %c0_i32 : i32, i32
  }
  func.func @transform_1(%arg0: i32) -> (i32, i32) {
    %c0_i32 = arith.constant 0 : i32
    %c0_i32_0 = arith.constant 0 : i32
    %c0_i32_1 = arith.constant 0 : i32
    return %c0_i32, %c0_i32_0 : i32, i32
  }
  func.func @transform_2(%arg0: i32) -> (i32, i32) {
    %c0_i32 = arith.constant 0 : i32
    %c0_i32_0 = arith.constant 0 : i32
    %c0_i32_1 = arith.constant 0 : i32
    return %c0_i32, %c0_i32_0 : i32, i32
  }
  func.func @transform_3(%arg0: i32) -> (i32, i32) {
    %c0_i32 = arith.constant 0 : i32
    %c0_i32_0 = arith.constant 0 : i32
    %c0_i32_1 = arith.constant 0 : i32
    return %c0_i32, %c0_i32_0 : i32, i32
  }
  func.func @transform_4(%arg0: i32) -> (i32, i32) {
    %c0_i32 = arith.constant 0 : i32
    %c0_i32_0 = arith.constant 0 : i32
    %c0_i32_1 = arith.constant 0 : i32
    return %c0_i32, %c0_i32_0 : i32, i32
  }
  func.func @transform_5(%arg0: i32) -> (i32, i32) {
    %c0_i32 = arith.constant 0 : i32
    %c0_i32_0 = arith.constant 0 : i32
    return %arg0, %c0_i32 : i32, i32
  }
}

</mosaic_0001>

<bundles_post_ra>
// kernel: tpu_custom_call.1
= control target key start
LH: loop header
LB: loop body
LE: loop exit
PB: predicated region body
PF: predicated region fallthrough
CT: control target
= control target key end

     0   :  { %10 = vsyncpa [#allocation3], 0  ;;  %s2730_s0 = inlined_call_operand.hbm [shape: bf16[512,128], index: 0, kind: input, shape index: {}]   ;;  %s2731_s1 = inlined_call_operand.hbm [shape: bf16[128,256], index: 1, kind: input, shape index: {}]   ;;  %s2732_s2 = inlined_call_operand.vmem [shape: f32[1,256], index: 2, kind: input, shape index: {}]   ;;  %s2733_s3 = inlined_call_operand.hbm [shape: bf16[256,128], index: 3, kind: input, shape index: {}]   ;;  %s2734_s4 = inlined_call_operand.vmem [shape: f32[1,128], index: 4, kind: input, shape index: {}]   ;;  %s2735_s5 = inlined_call_operand.hbm [shape: f32[512,128], index: 5, kind: output, shape index: {}]  }
   0x1   :  { %12 = vsyncpa [#allocation3 + $0x1], 0 }
   0x2   :  { %13 = vsyncpa [#allocation6], 0 }
   0x3   :  { %14 = vsyncpa [#allocation4], 0 }
   0x4   :  { %16 = vsyncpa [#allocation4 + $0x1], 0  ;;  %s2128_s18 = smov 0   ;;  %s2130_s19 = smov 0  }
   0x5   :  { %s2132_s20 = smov 0   ;;  %s2134_s21 = smov 0  }
   0x6 LB: > { %s2149_s22 = sadd.s32 4294967295, %s2085_s21   ;;  %s1490_s23 = sadd.s32 4294967294, %s2085_s21   ;;  %s2085_s21 = sphi %s2134_s21, %s2755_s21   ;;  %s2081_s20 = sphi %s2132_s20, %s2754_s20   ;;  %s2077_s19 = sphi %s2130_s19, %s2753_s19   ;;  %s2073_s18 = sphi %s2128_s18, %s2752_s18  }
   0x7   : > { %p42_p0 = scmp.ne.s32.totalorder %s2077_s19, %s2073_s18  ;;  %p2736_p1 = scmp.eq.s32.totalorder %s2149_s22, 0 }
   0x8   : > { %p156_p3 = scmp.eq.s32.totalorder %s1490_s23, 1  ;;  %p1491_p5 = scmp.ge.s32.totalorder %s2085_s21, 1 }
   0x9   : > { %p2158_p4 = por %p2736_p1, %p42_p0  ;;  %p163_p7 = scmp.lt.s32.totalorder %s2085_s21, 3 }
   0xa   : > { %p2163_p6 = por %p156_p3, %p42_p0  ;;  %s2087_s27 = smov [#allocation5]  }
   0xb   : > { %s2739_s24 = scalar_select %p2158_p4, 1, 0 }
   0xc   : > { %s2740_s25 = scalar_select %p2163_p6, 1, 0 }
   0xd   : > { %p2168_p8 = pnand %p1491_p5, %p163_p7  ;;  %s175_s28 = sshll.u32 %s2087_s27, 4  ;;  %s2172_s28 = int_to_ptr.vmem [resolvable:$true] %s175_s28 }
   0xe   : > { %s2088_s30 = smov [#allocation7]   ;;  %s1929_s9 = scalar_lea.hbm %s2731_s1, 2048 }
   0xf   : > { %p1683_p9 = pneg %p2168_p8  ;;  %s191_s6 = sshll.u32 %s2088_s30, 4  ;;  %s2183_s6 = int_to_ptr.vmem [resolvable:$true] %s191_s6 }
  0x10   : > { %p1930_p12 = scmp.ne.s32.totalorder %s2731_s1, %s1929_s9  ;;  %p1936_p5 = scmp.lt.u32.totalorder %s1929_s9, %s2731_s1 }
  0x11   : > { %p2179_p11 = pnand %p1683_p9, %p2736_p1 }
  0x13   : > { %p1931_p13 = pneg %p2179_p11 }
  0x15   : > { %p1932_p0 = pnand %p1931_p13, %p1930_p12 }
  0x17   : > { %p1933_p3 = pneg %p1932_p0 }
  0x19   : > { %p1938_p7 = pnand %p1936_p5, %p1933_p3 }
  0x1b   : > { %1941 = shalt.err (!%p1938_p7)
}
  0x1c   : > { %s1942_s14 = scalar_lea.vmem %s2172_s28, 2048  ;;  %p1950_p2 = scmp.lt.s32.totalorder %s2172_s28, %s2172_s28 }
  0x1d   : > { %p1943_p9 = scmp.ne.s32.totalorder %s2172_s28, %s1942_s14  ;;  %p1951_p12 = scmp.lt.s32.totalorder %s1942_s14, %s1942_s14 }
  0x1f   : > { %p1945_p10 = pnand %p1943_p9, %p1931_p13  ;;  %p1952_p0 = por %p1951_p12, %p1950_p2 }
  0x21   : > { %p1946_p1 = pneg %p1945_p10 }
  0x23   : > { %p1953_p6 = pnand %p1952_p0, %p1946_p1 }
  0x25   : > { %1956 = shalt.err (!%p1953_p6)
}
  0x26   : > { %s2089_s15 = smov 128   ;;  %s2090_s16 = smov 8  }
  0x27   : > { %1686 = dma.hbm_to_vmem [thread:$0]  (!%p2179_p11), %s2731_s1, 2048, %s2172_s28, [#allocation6], %s2089_s15, %s2089_s15, %s2090_s16  }
  0x28   : > { %s1957_s7 = scalar_lea.hbm %s2733_s3, 2048 }
  0x29   : > { %p1958_p2 = scmp.ne.s32.totalorder %s2733_s3, %s1957_s7  ;;  %p1964_p10 = scmp.lt.u32.totalorder %s1957_s7, %s2733_s3 }
  0x2b   : > { %p1960_p1 = pnand %p1958_p2, %p1931_p13 }
  0x2d   : > { %p1961_p6 = pneg %p1960_p1 }
  0x2f   : > { %p1966_p3 = pnand %p1964_p10, %p1961_p6 }
  0x31   : > { %1969 = shalt.err (!%p1966_p3)
}
  0x32   : > { %s1970_s28 = scalar_lea.vmem %s2183_s6, 2048  ;;  %p1978_p12 = scmp.lt.s32.totalorder %s2183_s6, %s2183_s6 }
  0x33   : > { %p1971_p5 = scmp.ne.s32.totalorder %s2183_s6, %s1970_s28  ;;  %p1979_p0 = scmp.lt.s32.totalorder %s1970_s28, %s1970_s28 }
  0x35   : > { %p1973_p7 = pnand %p1971_p5, %p1931_p13  ;;  %p1980_p2 = por %p1979_p0, %p1978_p12 }
  0x37   : > { %p1974_p9 = pneg %p1973_p7 }
  0x39   : > { %p1981_p1 = pnand %p1980_p2, %p1974_p9 }
  0x3b   : > { %1984 = shalt.err (!%p1981_p1)
}
  0x3c   : > { %s2091_s12 = smov 64   ;;  %s2092_s13 = smov 4  }
  0x3d   : > { %1689 = dma.hbm_to_vmem [thread:$0]  (!%p2179_p11), %s2733_s3, 2048, %s2183_s6, [#allocation6], %s2091_s12, %s2091_s12, %s2092_s13  }
  0x3e   : > { %s2241_s16 = sadd.s32 1, %s2085_s21   ;;  %s29_s23 = sadd.s32 1, %s2081_s20 }
  0x3f   : > { %s26_s17 = ssub.s32 %s2085_s21, %s2241_s16  ;;  %p36_p6 = scmp.ne.s32.totalorder %s2081_s20, %s2077_s19 }
  0x40   : > { %p27_p13 = scmp.eq.s32.totalorder %s26_s17, 0  ;;  %p37_p10 = scmp.eq.s32.totalorder %s2085_s21, 0 }
  0x41   : > { %p2743_p5 = scmp.eq.s32.totalorder %s2149_s22, 1  ;;  %p1700_p9 = scmp.lt.s32.totalorder %s2085_s21, 2 }
  0x42   : > { %s2250_s27 = scalar_select %p27_p13, %s2081_s20, %s29_s23  }
  0x43   : > { %p38_p3 = por %p37_p10, %p36_p6  ;;  %p2254_p7 = por %p2743_p5, %p36_p6 }
  0x44   : > { %s208_s30 = sand.u32 1, %s2081_s20   ;;  %s1557_s6 = sshll.u32 %s2085_s21, 11 }
  0x45   : > { %s2744_s29 = scalar_select %p2254_p7, 1, 0 }
  0x46   : > { %s1495_s7 = sshll.u32 %s208_s30, 7  ;;  %s2264_s10 = scalar_lea.hbm %s2730_s0, %s1557_s6 }
  0x47   : > { %s212_s11 = scalar_lea.vmem [#allocation2], %s1495_s7  ;;  %p2268_p11 = pnand %p1700_p9, %p38_p3 }
  0x48   : > { %s219_s28 = sshll.u32 %s212_s11, 4  ;;  %s2272_s15 = scalar_lea.sflag [#allocation3], %s208_s30  ;;  %s2266_s28 = int_to_ptr.vmem [resolvable:$true] %s219_s28 }
  0x49   : > { %s1985_s17 = scalar_lea.hbm %s2264_s10, 2048  ;;  %p1987_p0 = pneg %p2268_p11 }
  0x4a   : > { %p1986_p12 = scmp.ne.s32.totalorder %s2264_s10, %s1985_s17  ;;  %s1990_s6 = scalar_lea.hbm %s2730_s0, 4096 }
  0x4b   : > { %p1991_p13 = scmp.lt.u32.totalorder %s2264_s10, %s2730_s0  ;;  %p1992_p6 = scmp.lt.u32.totalorder %s1990_s6, %s1985_s17 }
  0x4c   : > { %p1988_p2 = pnand %p1987_p0, %p1986_p12  ;;  %p1994_p3 = scmp.lt.u32.totalorder %s1985_s17, %s2264_s10 }
  0x4d   : > { %p1993_p10 = por %p1992_p6, %p1991_p13 }
  0x4e   : > { %p1989_p1 = pneg %p1988_p2 }
  0x4f   : > { %p1995_p5 = por %p1994_p3, %p1993_p10 }
  0x51   : > { %p1996_p9 = pnand %p1995_p5, %p1989_p1 }
  0x53   : > { %1999 = shalt.err (!%p1996_p9)
}
  0x54   : > { %s2000_s30 = scalar_lea.vmem %s2266_s28, 2048  ;;  %s2093_s11 = smov [#allocation2]  }
  0x55   : > { %p2001_p12 = scmp.ne.s32.totalorder %s2266_s28, %s2000_s30  ;;  %s2005_s23 = sshll.u32 %s2093_s11, 4  ;;  %s2006_s23 = int_to_ptr.vmem [resolvable:$false] %s2005_s23 }
  0x56   : > { %s2007_s7 = scalar_lea.vmem %s2006_s23, 4096  ;;  %p2008_p4 = scmp.lt.s32.totalorder %s2266_s28, %s2006_s23 }
  0x57   : > { %p2003_p2 = pnand %p2001_p12, %p1987_p0  ;;  %p2009_p13 = scmp.lt.s32.totalorder %s2007_s7, %s2000_s30 }
  0x59   : > { %p2004_p7 = pneg %p2003_p2  ;;  %p2010_p6 = por %p2009_p13, %p2008_p4 }
  0x5b   : > { %p2011_p10 = pnand %p2010_p6, %p2004_p7 }
  0x5d   : > { %2014 = shalt.err (!%p2011_p10)
}
  0x5e   : > { %1693 = dma.hbm_to_vmem [thread:$0]  (!%p2268_p11), %s2264_s10, 2048, %s2266_s28, %s2272_s15, %s2091_s12, %s2091_s12, %s2092_s13  }
  0x5f   : > { %231 = sbr.rel (%p2168_p8) target bundleno = 730 (0x2da), region = 40  ;;  %s2306_s17 = sand.u32 (!%p2168_p8), 1, %s2077_s19  }
  0x60   : > { %s1499_s6 = sshll.u32 (!%p2168_p8), %s2306_s17, 7  ;;  %s234_s8 = scalar_lea.sflag (!%p2168_p8), [#allocation3], %s2306_s17 }
  0x61   : > { %s2310_s9 = scalar_lea.vmem (!%p2168_p8), [#allocation2], %s1499_s6  ;;  %p2746_p4 = scmp.ne.s32.totalorder (!%p2168_p8), %s2739_s24, 0 }
  0x66   : > { %2060 = dma.done.wait (%p2746_p4), %s234_s8, 2048  }
  0x67   : > { %2062 = vsyncadd (%p2746_p4), %s234_s8, 4294965248  ;;  %p2747_p7 = scmp.eq.s32.totalorder %s2149_s22, 0 }
  0x69   : > { %2064 = dma.done.wait (%p2747_p7), [#allocation6], 4096   ;;  %p2748_p8 = pmov %p2747_p7 }
  0x6a   : > { %v2094_v0 = vmov 0   ;;  %v1745_v1 = vld [vmem:[#allocation5 + $0x4] ss:$8 sps:$4 sm:$0xff]   ;;  %v1747_v2 = vld [vmem:[#allocation5] ss:$8 sps:$4 sm:$0xff]   ;;  %v1771_v23 = vld [vmem:[%s2310_s9 + $0x10] sm:$0xff]   ;;  %v325_v49 = vlaneseq }
  0x6b   : > { %2066 = vsyncadd (%p2748_p8), [#allocation6], 4294963200  ;;  %543 = vmatprep.mubr.bf16.mxu0 %v2094_v0  ;;  %511 = vmatprep.subr.bf16.mxu0 %v1745_v1  ;;  %v1748_v3 = vld [vmem:[#allocation5 + $0x14] ss:$8 sps:$4 sm:$0xff]   ;;  %v1750_v4 = vld [vmem:[#allocation5 + $0x10] ss:$8 sps:$4 sm:$0xff]  }
  0x6c   : > { %512 = vmatpush1.bf16.msra.mxu0 %v1747_v2  ;;  %v1751_v5 = vld [vmem:[#allocation5 + $0x24] ss:$8 sps:$4 sm:$0xff]   ;;  %v1753_v6 = vld [vmem:[#allocation5 + $0x20] ss:$8 sps:$4 sm:$0xff]   ;;  %v1754_v7 = vld [vmem:[#allocation5 + $0x34] ss:$8 sps:$4 sm:$0xff]  }
  0x6d   : > { %513 = vmatprep.subr.bf16.mxu0 %v1748_v3  ;;  %v1756_v8 = vld [vmem:[#allocation5 + $0x30] ss:$8 sps:$4 sm:$0xff]   ;;  %v1757_v9 = vld [vmem:[#allocation5 + $0x44] ss:$8 sps:$4 sm:$0xff]   ;;  %v1759_v10 = vld [vmem:[#allocation5 + $0x40] ss:$8 sps:$4 sm:$0xff]  }
  0x6e   : > { %v1760_v11 = vld [vmem:[#allocation5 + $0x54] ss:$8 sps:$4 sm:$0xff]   ;;  %v1762_v12 = vld [vmem:[#allocation5 + $0x50] ss:$8 sps:$4 sm:$0xff]   ;;  %v1763_v13 = vld [vmem:[#allocation5 + $0x64] ss:$8 sps:$4 sm:$0xff]  }
  0x6f   : > { %v1765_v14 = vld [vmem:[#allocation5 + $0x60] ss:$8 sps:$4 sm:$0xff]   ;;  %v1766_v15 = vld [vmem:[#allocation5 + $0x74] ss:$8 sps:$4 sm:$0xff]   ;;  %v1768_v16 = vld [vmem:[#allocation5 + $0x70] ss:$8 sps:$4 sm:$0xff]  }
  0x70   : > { %514 = vmatpush1.bf16.msra.mxu0 %v1750_v4  ;;  %v1785_v17 = vld [vmem:[#allocation7 + $0x40] sm:$0xff]   ;;  %v1787_v19 = vld [vmem:[#allocation7 + $0x48] sm:$0xff]   ;;  %v1772_v24 = vld [vmem:[%s2310_s9 + $0x18] sm:$0xff]   ;;  %v326_v50 = vshrl.u32 %v325_v49, 7  ;;  %s1502_s12 = sshll.u32 %s2306_s17, 8  ;;  %s1558_s14 = sshll.u32 %s2149_s22, 12 }
  0x71   : > { %515 = vmatprep.subr.bf16.mxu0 %v1751_v5  ;;  %v1786_v18 = vld [vmem:[#allocation7] sm:$0xff]   ;;  %1559 = vmatprep.subr.bf16.mxu1 %v1785_v17  ;;  %v1788_v21 = vld [vmem:[#allocation7 + $0x8] sm:$0xff]   ;;  %v1775_v27 = vld [vmem:[%s2310_s9 + $0x30] sm:$0xff]   ;;  %s2614_s28 = scalar_lea.vmem [#allocation8], %s1502_s12  ;;  %s2681_s23 = scalar_lea.hbm %s2735_s5, %s1558_s14 }
  0x72   : > { %v1769_v20 = vld [vmem:[%s2310_s9] sm:$0xff]   ;;  %1560 = vmatpush3.bf16.msra.mxu1 %v1786_v18  ;;  %v1770_v22 = vld [vmem:[%s2310_s9 + $0x8] sm:$0xff]   ;;  %v1776_v28 = vld [vmem:[%s2310_s9 + $0x38] sm:$0xff]   ;;  %v327_v51 = vsub.s32 0, %v326_v50  ;;  %v331_v53 = vsub.s32 1, %v326_v50  ;;  %s1398_s15 = sshll.u32 %s2614_s28, 4  ;;  %s2683_s15 = int_to_ptr.vmem [resolvable:$true] %s1398_s15 }
  0x73   : > { %1561 = vmatprep.subr.bf16.mxu1 %v1787_v19  ;;  %v1773_v25 = vld [vmem:[%s2310_s9 + $0x20] sm:$0xff]   ;;  %v1774_v26 = vld [vmem:[%s2310_s9 + $0x28] sm:$0xff]   ;;  %v1779_v31 = vld [vmem:[%s2310_s9 + $0x50] sm:$0xff]   ;;  %s1385_s22 = scalar_lea.sflag [#allocation4], %s2306_s17  ;;  %s2015_s7 = scalar_lea.vmem %s2683_s15, 4096 }
  0x74   : > { %516 = vmatpush1.bf16.msra.mxu0 %v1753_v6  ;;  %v1777_v29 = vld [vmem:[%s2310_s9 + $0x40] sm:$0xff]   ;;  %v1778_v30 = vld [vmem:[%s2310_s9 + $0x48] sm:$0xff]   ;;  %v1789_v32 = vld [vmem:[#allocation7 + $0x50] sm:$0xff]   ;;  %p2016_p11 = scmp.ne.s32.totalorder %s2683_s15, %s2015_s7  ;;  %p2749_p0 = scmp.ne.s32.totalorder %s2744_s29, 0 }
  0x75   : > { %517 = vmatprep.subr.bf16.mxu0 %v1754_v7  ;;  %v1780_v33 = vld [vmem:[%s2310_s9 + $0x58] sm:$0xff]   ;;  %v1790_v34 = vld [vmem:[#allocation7 + $0x10] sm:$0xff]   ;;  %v1793_v37 = vld [vmem:[#allocation7 + $0x60] sm:$0xff]   ;;  %s2095_s6 = smov [#allocation8]  }
  0x76   : > { %1562 = vmatpush3.bf16.msra.mxu1 %v1788_v21  ;;  %v1791_v35 = vld [vmem:[#allocation7 + $0x58] sm:$0xff]   ;;  %v1781_v38 = vld [vmem:[%s2310_s9 + $0x60] sm:$0xff]   ;;  %v1795_v40 = vld [vmem:[#allocation7 + $0x68] sm:$0xff]   ;;  %p2017_p1 = pnand %p2016_p11, %p2749_p0  ;;  %s2019_s8 = sshll.u32 %s2095_s6, 4  ;;  %s2020_s8 = int_to_ptr.vmem [resolvable:$false] %s2019_s8 }
  0x77   : > { %1563 = vmatprep.subr.bf16.mxu1 %v1789_v32  ;;  %v1792_v36 = vld [vmem:[#allocation7 + $0x18] sm:$0xff]   ;;  %v1794_v39 = vld [vmem:[#allocation7 + $0x20] sm:$0xff]   ;;  %v1796_v41 = vld [vmem:[#allocation7 + $0x28] sm:$0xff]   ;;  %p2022_p5 = scmp.lt.s32.totalorder %s2683_s15, %s2020_s8 }
  0x78   : > { %518 = vmatpush1.bf16.msra.mxu0 %v1756_v8  ;;  %v1797_v42 = vld [vmem:[#allocation7 + $0x70] sm:$0xff]   ;;  %v1782_v43 = vld [vmem:[%s2310_s9 + $0x68] sm:$0xff]   ;;  %v1799_v45 = vld [vmem:[#allocation7 + $0x78] sm:$0xff]   ;;  %p2018_p3 = pneg %p2017_p1 }
  0x79   : > { %519 = vmatprep.subr.bf16.mxu0 %v1757_v9  ;;  %v1798_v44 = vld [vmem:[#allocation7 + $0x30] sm:$0xff]   ;;  %v1800_v46 = vld [vmem:[#allocation7 + $0x38] sm:$0xff]   ;;  %v323_v52 = vld [vmem:[%s2732_s2] sm:$0x3] }
  0x7a   : > { %1564 = vmatpush3.bf16.msra.mxu1 %v1790_v34  ;;  %v1783_v47 = vld [vmem:[%s2310_s9 + $0x70] sm:$0xff]   ;;  %v1784_v48 = vld [vmem:[%s2310_s9 + $0x78] sm:$0xff]   ;;  %v2355_v54 = vrot.slane %v323_v52, %v327_v51  ;;  %v2357_v55 = vrot.slane %v323_v52, %v331_v53  ;;  %s2021_s9 = scalar_lea.vmem %s2020_s8, 8192 }
  0x7b   : > { %1565 = vmatprep.subr.bf16.mxu1 %v1791_v35  ;;  %p2023_p9 = scmp.lt.s32.totalorder %s2021_s9, %s2015_s7 }
  0x7c   : > { %520 = vmatpush1.bf16.msra.mxu0 %v1759_v10 }
  0x7d   : > { %521 = vmatprep.subr.bf16.mxu0 %v1760_v11  ;;  %p2024_p12 = por %p2023_p9, %p2022_p5 }
  0x7e   : > { %1566 = vmatpush3.bf16.msra.mxu1 %v1792_v36 }
  0x7f   : > { %1567 = vmatprep.subr.bf16.mxu1 %v1793_v37  ;;  %p2025_p2 = pnand %p2024_p12, %p2018_p3 }
  0x80   : > { %522 = vmatpush1.bf16.msra.mxu0 %v1762_v12 }
  0x81   : > { %523 = vmatprep.subr.bf16.mxu0 %v1763_v13 }
  0x82   : > { %1568 = vmatpush3.bf16.msra.mxu1 %v1794_v39 }
  0x83   : > { %1569 = vmatprep.subr.bf16.mxu1 %v1795_v40 }
  0x84   : > { %524 = vmatpush1.bf16.msra.mxu0 %v1765_v14 }
  0x85   : > { %525 = vmatprep.subr.bf16.mxu0 %v1766_v15 }
  0x86   : > { %1570 = vmatpush3.bf16.msra.mxu1 %v1796_v41 }
  0x87   : > { %1571 = vmatprep.subr.bf16.mxu1 %v1797_v42 }
  0x88   : > { %526 = vmatpush1.bf16.msra.mxu0 %v1768_v16 }
  0x8a   : > { %1572 = vmatpush3.bf16.msra.mxu1 %v1798_v44 }
  0x8b   : > { %544 = vmatmul.mubr.bf16.vlgmr.msra.gmra.mrb[0].mxu0 %v1769_v20  ;;  %1573 = vmatprep.subr.bf16.mxu1 %v1799_v45 }
  0x8c   : > { %553 = vmatprep.mubr.bf16.mxu0 %v2094_v0 }
  0x8e   : > { %1574 = vmatpush3.bf16.msra.mxu1 %v1800_v46 }
  0x93   : > { %554 = vmatmul.mubr.bf16.gmra.mrb[4].mxu0 %v1770_v22 }
  0x94   : > { %563 = vmatprep.mubr.bf16.mxu0 %v2094_v0 }
  0x9b   : > { %564 = vmatmul.mubr.bf16.gmra.mrb[8].mxu0 %v1771_v23 }
  0x9c   : > { %573 = vmatprep.mubr.bf16.mxu0 %v2094_v0 }
  0xa3   : > { %574 = vmatmul.mubr.bf16.gmra.mrb[12].mxu0 %v1772_v24 }
  0xa4   : > { %583 = vmatprep.mubr.bf16.mxu0 %v2094_v0 }
  0xab   : > { %584 = vmatmul.mubr.bf16.gmra.mrb[16].mxu0 %v1773_v25 }
  0xac   : > { %593 = vmatprep.mubr.bf16.mxu0 %v2094_v0 }
  0xb3   : > { %594 = vmatmul.mubr.bf16.gmra.mrb[20].mxu0 %v1774_v26 }
  0xb4   : > { %603 = vmatprep.mubr.bf16.mxu0 %v2094_v0 }
  0xbb   : > { %604 = vmatmul.mubr.bf16.gmra.mrb[24].mxu0 %v1775_v27 }
  0xbc   : > { %613 = vmatprep.mubr.bf16.mxu0 %v2094_v0 }
  0xc3   : > { %614 = vmatmul.mubr.bf16.gmra.mrb[28].mxu0 %v1776_v28 }
  0xc4   : > { %623 = vmatprep.mubr.bf16.mxu0 %v2094_v0 }
  0xcb   : > { %624 = vmatmul.mubr.bf16.gmra.mrb[32].mxu0 %v1777_v29 }
  0xcc   : > { %633 = vmatprep.mubr.bf16.mxu0 %v2094_v0 }
  0xd3   : > { %634 = vmatmul.mubr.bf16.gmra.mrb[36].mxu0 %v1778_v30 }
  0xd4   : > { %643 = vmatprep.mubr.bf16.mxu0 %v2094_v0 }
  0xdb   : > { %644 = vmatmul.mubr.bf16.gmra.mrb[40].mxu0 %v1779_v31 }
  0xdc   : > { %653 = vmatprep.mubr.bf16.mxu0 %v2094_v0 }
  0xe3   : > { %654 = vmatmul.mubr.bf16.gmra.mrb[44].mxu0 %v1780_v33 }
  0xe4   : > { %663 = vmatprep.mubr.bf16.mxu0 %v2094_v0 }
  0xeb   : > { %664 = vmatmul.mubr.bf16.gmra.mrb[48].mxu0 %v1781_v38 }
  0xec   : > { %673 = vmatprep.mubr.bf16.mxu0 %v2094_v0 }
  0xf3   : > { %674 = vmatmul.mubr.bf16.gmra.mrb[52].mxu0 %v1782_v43 }
  0xf4   : > { %683 = vmatprep.mubr.bf16.mxu0 %v2094_v0 }
  0xfb   : > { %684 = vmatmul.mubr.bf16.gmra.mrb[56].mxu0 %v1783_v47 }
  0xfc   : > { %693 = vmatprep.mubr.bf16.mxu0 %v2094_v0 }
 0x103   : > { %694 = vmatmul.mubr.bf16.gmra.mrb[60].mxu0 %v1784_v48 }
 0x15e   : > { %v545_v56 = vpop.f32.mrb[0].mxu0 }
 0x15f   : > { %v546_v57 = vadd.f32 %v545_v56, %v2355_v54  ;;  %v547_v58 = vpop.f32.mrb[1].mxu0 }
 0x160   : > { %v548_v59 = vadd.f32 %v547_v58, %v2357_v55  ;;  %v549_v60 = vpop.f32.mrb[2].mxu0 }
 0x161   : > { %v768_v61 = vmul.f32 0.70710677, %v546_v57  ;;  %v550_v62 = vadd.f32 %v549_v60, %v2355_v54  ;;  %v551_v63 = vpop.f32.mrb[3].mxu0  ;;  %v704_v20 = vmul.f32 0.5, %v546_v57 }
 0x162   : > { %v769_v0 = vmul.f32 0.70710677, %v548_v59  ;;  %v552_v1 = vadd.f32 %v551_v63, %v2357_v55  ;;  %v705_v30 = vmul.f32 0.5, %v548_v59 }
 0x163   : > { %1801 = verf.f32 %v768_v61  ;;  %v770_v2 = vmul.f32 0.70710677, %v550_v62  ;;  %v706_v25 = vmul.f32 0.5, %v550_v62 }
 0x164   : > { %1803 = verf.f32 %v769_v0  ;;  %v771_v3 = vmul.f32 0.70710677, %v552_v1  ;;  %v707_v36 = vmul.f32 0.5, %v552_v1 }
 0x165   : > { %1805 = verf.f32 %v770_v2 }
 0x166   : > { %1807 = verf.f32 %v771_v3  ;;  %v555_v4 = vpop.f32.mrb[4].mxu0 }
 0x167   : > { %v556_v5 = vadd.f32 %v555_v4, %v2355_v54  ;;  %v557_v6 = vpop.f32.mrb[5].mxu0 }
 0x168   : > { %v558_v7 = vadd.f32 %v557_v6, %v2357_v55  ;;  %v559_v8 = vpop.f32.mrb[6].mxu0 }
 0x169   : > { %v772_v9 = vmul.f32 0.70710677, %v556_v5  ;;  %v560_v10 = vadd.f32 %v559_v8, %v2355_v54  ;;  %v561_v11 = vpop.f32.mrb[7].mxu0  ;;  %v708_v57 = vmul.f32 0.5, %v556_v5 }
 0x16a   : > { %v773_v12 = vmul.f32 0.70710677, %v558_v7  ;;  %v562_v13 = vadd.f32 %v561_v11, %v2357_v55  ;;  %v709_v62 = vmul.f32 0.5, %v558_v7 }
 0x16b   : > { %1809 = verf.f32 %v772_v9  ;;  %v774_v14 = vmul.f32 0.70710677, %v560_v10  ;;  %v710_v58 = vmul.f32 0.5, %v560_v10 }
 0x16c   : > { %1811 = verf.f32 %v773_v12  ;;  %v775_v15 = vmul.f32 0.70710677, %v562_v13  ;;  %v711_v63 = vmul.f32 0.5, %v562_v13 }
 0x16d   : > { %v1802_v16 = vpop.eup %1801  ;;  %1813 = verf.f32 %v774_v14 }
 0x16e   : > { %v1804_v17 = vpop.eup %1803  ;;  %1815 = verf.f32 %v775_v15  ;;  %v565_v18 = vpop.f32.mrb[8].mxu0  ;;  %v896_v21 = vadd.f32 1.0, %v1802_v16 }
 0x16f   : > { %v1806_v19 = vpop.eup %1805  ;;  %v2368_v22 = vadd.f32 %v565_v18, %v2355_v54  ;;  %v567_v23 = vpop.f32.mrb[9].mxu0  ;;  %v897_v29 = vadd.f32 1.0, %v1804_v17 }
 0x170   : > { %v1808_v24 = vpop.eup %1807  ;;  %v898_v26 = vadd.f32 1.0, %v1806_v19  ;;  %v2371_v27 = vadd.f32 %v567_v23, %v2357_v55  ;;  %v569_v28 = vpop.f32.mrb[10].mxu0  ;;  %v960_v39 = vmul.f32 %v896_v21, %v704_v20 }
 0x171   : > { %v776_v31 = vmul.f32 0.70710677, %v2368_v22  ;;  %v2375_v32 = vadd.f32 %v569_v28, %v2355_v54  ;;  %v571_v33 = vpop.f32.mrb[11].mxu0  ;;  %v899_v34 = vadd.f32 1.0, %v1808_v24  ;;  %v961_v42 = vmul.f32 %v897_v29, %v705_v30 }
 0x172   : > { %v962_v35 = vmul.f32 %v898_v26, %v706_v25  ;;  %v777_v37 = vmul.f32 0.70710677, %v2371_v27  ;;  %v2379_v38 = vadd.f32 %v571_v33, %v2357_v55  ;;  %v712_v24 = vmul.f32 0.5, %v2368_v22 }
 0x173   : > { %1817 = verf.f32 %v776_v31  ;;  %v778_v40 = vmul.f32 0.70710677, %v2375_v32  ;;  %v963_v43 = vmul.f32 %v899_v34, %v707_v36  ;;  %v714_v25 = vmul.f32 0.5, %v2375_v32 }
 0x174   : > { %1819 = verf.f32 %v777_v37  ;;  %v779_v41 = vmul.f32 0.70710677, %v2379_v38  ;;  %v1024_v45 = vpack.c.bf16 %v962_v35, %v960_v39  ;;  %v713_v30 = vmul.f32 0.5, %v2371_v27 }
 0x175   : > { %v1810_v44 = vpop.eup %1809  ;;  %1821 = verf.f32 %v778_v40  ;;  %v1025_v49 = vpack.c.bf16 %v963_v43, %v961_v42  ;;  %v715_v31 = vmul.f32 0.5, %v2379_v38 }
 0x176   : > { %v1812_v46 = vpop.eup %1811  ;;  %v900_v47 = vadd.f32 1.0, %v1810_v44  ;;  %1823 = verf.f32 %v779_v41  ;;  %v575_v48 = vpop.f32.mrb[12].mxu0 }
 0x177   : > { %v1814_v50 = vpop.eup %1813  ;;  %v901_v51 = vadd.f32 1.0, %v1812_v46  ;;  %v2384_v52 = vadd.f32 %v575_v48, %v2355_v54  ;;  %v577_v53 = vpop.f32.mrb[13].mxu0  ;;  %1223 = vmatprep.mubr.bf16.mxu1 %v1025_v49 }
 0x178   : > { %v1816_v56 = vpop.eup %1815  ;;  %v902_v59 = vadd.f32 1.0, %v1814_v50  ;;  %v2387_v60 = vadd.f32 %v577_v53, %v2357_v55  ;;  %v579_v61 = vpop.f32.mrb[14].mxu0  ;;  %1224 = vmatmul.mubr.bf16.vlgmr.msra.gmra.mrb[0].mxu1 %v1024_v45  ;;  %v964_v3 = vmul.f32 %v900_v47, %v708_v57 }
 0x179   : > { %v903_v0 = vadd.f32 1.0, %v1816_v56  ;;  %v780_v1 = vmul.f32 0.70710677, %v2384_v52  ;;  %v581_v2 = vpop.f32.mrb[15].mxu0  ;;  %v580_v5 = vadd.f32 %v579_v61, %v2355_v54  ;;  %v965_v8 = vmul.f32 %v901_v51, %v709_v62 }
 0x17a   : > { %v966_v4 = vmul.f32 %v902_v59, %v710_v58  ;;  %v781_v6 = vmul.f32 0.70710677, %v2387_v60  ;;  %v582_v10 = vadd.f32 %v581_v2, %v2357_v55  ;;  %v716_v51 = vmul.f32 0.5, %v2384_v52 }
 0x17b   : > { %v967_v9 = vmul.f32 %v903_v0, %v711_v63  ;;  %1825 = verf.f32 %v780_v1  ;;  %v782_v11 = vmul.f32 0.70710677, %v580_v5  ;;  %v717_v59 = vmul.f32 0.5, %v2387_v60 }
 0x17c   : > { %1827 = verf.f32 %v781_v6  ;;  %v1026_v7 = vpack.c.bf16 %v966_v4, %v964_v3  ;;  %v783_v13 = vmul.f32 0.70710677, %v582_v10  ;;  %v718_v61 = vmul.f32 0.5, %v580_v5 }
 0x17d   : > { %v1818_v12 = vpop.eup %1817  ;;  %v1027_v14 = vpack.c.bf16 %v967_v9, %v965_v8  ;;  %1829 = verf.f32 %v782_v11  ;;  %v719_v1 = vmul.f32 0.5, %v582_v10 }
 0x17e   : > { %v1820_v15 = vpop.eup %1819  ;;  %v904_v16 = vadd.f32 1.0, %v1818_v12  ;;  %v585_v17 = vpop.f32.mrb[16].mxu0  ;;  %1831 = verf.f32 %v783_v13 }
 0x17f   : > { %v1822_v18 = vpop.eup %1821  ;;  %v905_v19 = vadd.f32 1.0, %v1820_v15  ;;  %v2394_v20 = vadd.f32 %v585_v17, %v2355_v54  ;;  %v587_v21 = vpop.f32.mrb[17].mxu0  ;;  %1231 = vmatprep.mubr.bf16.mxu1 %v1027_v14 }
 0x180   : > { %v1824_v23 = vpop.eup %1823  ;;  %v906_v26 = vadd.f32 1.0, %v1822_v18  ;;  %v2399_v28 = vadd.f32 %v587_v21, %v2357_v55  ;;  %v589_v29 = vpop.f32.mrb[18].mxu0  ;;  %1232 = vmatmul.mubr.bf16.gmra.mrb[4].mxu1 %v1026_v7  ;;  %v968_v36 = vmul.f32 %v904_v16, %v712_v24 }
 0x181   : > { %v907_v33 = vadd.f32 1.0, %v1824_v23  ;;  %v784_v34 = vmul.f32 0.70710677, %v2394_v20  ;;  %v591_v35 = vpop.f32.mrb[19].mxu0  ;;  %v590_v32 = vadd.f32 %v589_v29, %v2355_v54  ;;  %v969_v39 = vmul.f32 %v905_v19, %v713_v30 }
 0x182   : > { %v970_v37 = vmul.f32 %v906_v26, %v714_v25  ;;  %v785_v22 = vmul.f32 0.70710677, %v2399_v28  ;;  %v592_v41 = vadd.f32 %v591_v35, %v2357_v55  ;;  %v720_v19 = vmul.f32 0.5, %v2394_v20 }
 0x183   : > { %v971_v40 = vmul.f32 %v907_v33, %v715_v31  ;;  %1833 = verf.f32 %v784_v34  ;;  %v786_v27 = vmul.f32 0.70710677, %v590_v32  ;;  %v721_v26 = vmul.f32 0.5, %v2399_v28 }
 0x184   : > { %1835 = verf.f32 %v785_v22  ;;  %v1028_v42 = vpack.c.bf16 %v970_v37, %v968_v36  ;;  %v787_v43 = vmul.f32 0.70710677, %v592_v41  ;;  %v722_v29 = vmul.f32 0.5, %v590_v32 }
 0x185   : > { %v1826_v38 = vpop.eup %1825  ;;  %v1029_v44 = vpack.c.bf16 %v971_v40, %v969_v39  ;;  %1837 = verf.f32 %v786_v27  ;;  %v723_v34 = vmul.f32 0.5, %v592_v41 }
 0x186   : > { %v1828_v45 = vpop.eup %1827  ;;  %v595_v46 = vpop.f32.mrb[20].mxu0  ;;  %v908_v47 = vadd.f32 1.0, %v1826_v38  ;;  %1839 = verf.f32 %v787_v43 }
 0x187   : > { %v2408_v48 = vadd.f32 %v595_v46, %v2355_v54  ;;  %v597_v49 = vpop.f32.mrb[21].mxu0  ;;  %1239 = vmatprep.mubr.bf16.mxu1 %v1029_v44  ;;  %v1830_v50 = vpop.eup %1829  ;;  %v909_v53 = vadd.f32 1.0, %v1828_v45 }
 0x188   : > { %v2412_v56 = vadd.f32 %v597_v49, %v2357_v55  ;;  %v599_v57 = vpop.f32.mrb[22].mxu0  ;;  %v1832_v58 = vpop.eup %1831  ;;  %v910_v62 = vadd.f32 1.0, %v1830_v50  ;;  %1240 = vmatmul.mubr.bf16.gmra.mrb[8].mxu1 %v1028_v42  ;;  %v972_v4 = vmul.f32 %v908_v47, %v716_v51 }
 0x189   : > { %v788_v63 = vmul.f32 0.70710677, %v2408_v48  ;;  %v601_v0 = vpop.f32.mrb[23].mxu0  ;;  %v911_v2 = vadd.f32 1.0, %v1832_v58  ;;  %v2418_v52 = vadd.f32 %v599_v57, %v2355_v54  ;;  %v973_v60 = vmul.f32 %v909_v53, %v717_v59 }
 0x18a   : > { %v789_v3 = vmul.f32 0.70710677, %v2412_v56  ;;  %v974_v6 = vmul.f32 %v910_v62, %v718_v61  ;;  %v2421_v8 = vadd.f32 %v601_v0, %v2357_v55  ;;  %v724_v50 = vmul.f32 0.5, %v2408_v48 }
 0x18b   : > { %1841 = verf.f32 %v788_v63  ;;  %v975_v5 = vmul.f32 %v911_v2, %v719_v1  ;;  %v790_v9 = vmul.f32 0.70710677, %v2418_v52  ;;  %v725_v59 = vmul.f32 0.5, %v2412_v56 }
 0x18c   : > { %1843 = verf.f32 %v789_v3  ;;  %v791_v10 = vmul.f32 0.70710677, %v2421_v8  ;;  %v1030_v7 = vpack.c.bf16 %v974_v6, %v972_v4  ;;  %v726_v61 = vmul.f32 0.5, %v2418_v52 }
 0x18d   : > { %v1834_v11 = vpop.eup %1833  ;;  %1845 = verf.f32 %v790_v9  ;;  %v1031_v14 = vpack.c.bf16 %v975_v5, %v973_v60  ;;  %v727_v1 = vmul.f32 0.5, %v2421_v8 }
 0x18e   : > { %v1836_v12 = vpop.eup %1835  ;;  %v605_v13 = vpop.f32.mrb[24].mxu0  ;;  %v912_v15 = vadd.f32 1.0, %v1834_v11  ;;  %1847 = verf.f32 %v791_v10 }
 0x18f   : > { %v2426_v16 = vadd.f32 %v605_v13, %v2355_v54  ;;  %v607_v17 = vpop.f32.mrb[25].mxu0  ;;  %v1838_v18 = vpop.eup %1837  ;;  %v913_v21 = vadd.f32 1.0, %v1836_v12  ;;  %1247 = vmatprep.mubr.bf16.mxu1 %v1031_v14 }
 0x190   : > { %v2430_v23 = vadd.f32 %v607_v17, %v2357_v55  ;;  %v609_v24 = vpop.f32.mrb[26].mxu0  ;;  %v1840_v25 = vpop.eup %1839  ;;  %v914_v30 = vadd.f32 1.0, %v1838_v18  ;;  %1248 = vmatmul.mubr.bf16.gmra.mrb[12].mxu1 %v1030_v7  ;;  %v976_v37 = vmul.f32 %v912_v15, %v720_v19 }
 0x191   : > { %v792_v31 = vmul.f32 0.70710677, %v2426_v16  ;;  %v611_v33 = vpop.f32.mrb[27].mxu0  ;;  %v915_v35 = vadd.f32 1.0, %v1840_v25  ;;  %v2436_v20 = vadd.f32 %v609_v24, %v2355_v54  ;;  %v977_v28 = vmul.f32 %v913_v21, %v721_v26 }
 0x192   : > { %v793_v36 = vmul.f32 0.70710677, %v2430_v23  ;;  %v978_v22 = vmul.f32 %v914_v30, %v722_v29  ;;  %v2439_v39 = vadd.f32 %v611_v33, %v2357_v55  ;;  %v728_v18 = vmul.f32 0.5, %v2426_v16 }
 0x193   : > { %1849 = verf.f32 %v792_v31  ;;  %v979_v32 = vmul.f32 %v915_v35, %v723_v34  ;;  %v794_v40 = vmul.f32 0.70710677, %v2436_v20  ;;  %v729_v26 = vmul.f32 0.5, %v2430_v23 }
 0x194   : > { %1851 = verf.f32 %v793_v36  ;;  %v795_v41 = vmul.f32 0.70710677, %v2439_v39  ;;  %v1032_v42 = vpack.c.bf16 %v978_v22, %v976_v37  ;;  %v730_v29 = vmul.f32 0.5, %v2436_v20 }
 0x195   : > { %v1842_v27 = vpop.eup %1841  ;;  %1853 = verf.f32 %v794_v40  ;;  %v1033_v44 = vpack.c.bf16 %v979_v32, %v977_v28  ;;  %v731_v34 = vmul.f32 0.5, %v2439_v39 }
 0x196   : > { %v1844_v38 = vpop.eup %1843  ;;  %v615_v43 = vpop.f32.mrb[28].mxu0  ;;  %v916_v45 = vadd.f32 1.0, %v1842_v27  ;;  %1855 = verf.f32 %v795_v41 }
 0x197   : > { %v2444_v46 = vadd.f32 %v615_v43, %v2355_v54  ;;  %v617_v47 = vpop.f32.mrb[29].mxu0  ;;  %v1846_v49 = vpop.eup %1845  ;;  %v917_v51 = vadd.f32 1.0, %v1844_v38  ;;  %1255 = vmatprep.mubr.bf16.mxu1 %v1033_v44 }
 0x198   : > { %v2448_v53 = vadd.f32 %v617_v47, %v2357_v55  ;;  %v619_v57 = vpop.f32.mrb[30].mxu0  ;;  %v1848_v58 = vpop.eup %1847  ;;  %v918_v62 = vadd.f32 1.0, %v1846_v49  ;;  %1256 = vmatmul.mubr.bf16.gmra.mrb[16].mxu1 %v1032_v42  ;;  %v980_v4 = vmul.f32 %v916_v45, %v724_v50 }
 0x199   : > { %v796_v63 = vmul.f32 0.70710677, %v2444_v46  ;;  %v621_v0 = vpop.f32.mrb[31].mxu0  ;;  %v919_v2 = vadd.f32 1.0, %v1848_v58  ;;  %v2456_v3 = vadd.f32 %v619_v57, %v2355_v54  ;;  %v981_v52 = vmul.f32 %v917_v51, %v725_v59 }
 0x19a   : > { %v797_v48 = vmul.f32 0.70710677, %v2448_v53  ;;  %v982_v6 = vmul.f32 %v918_v62, %v726_v61  ;;  %v2459_v56 = vadd.f32 %v621_v0, %v2357_v55  ;;  %v732_v49 = vmul.f32 0.5, %v2444_v46 }
 0x19b   : > { %1857 = verf.f32 %v796_v63  ;;  %v983_v60 = vmul.f32 %v919_v2, %v727_v1  ;;  %v798_v5 = vmul.f32 0.70710677, %v2456_v3  ;;  %v733_v59 = vmul.f32 0.5, %v2448_v53 }
 0x19c   : > { %1859 = verf.f32 %v797_v48  ;;  %v799_v8 = vmul.f32 0.70710677, %v2459_v56  ;;  %v1034_v11 = vpack.c.bf16 %v982_v6, %v980_v4  ;;  %v734_v61 = vmul.f32 0.5, %v2456_v3 }
 0x19d   : > { %v1850_v9 = vpop.eup %1849  ;;  %1861 = verf.f32 %v798_v5  ;;  %v1035_v12 = vpack.c.bf16 %v983_v60, %v981_v52  ;;  %v735_v1 = vmul.f32 0.5, %v2459_v56 }
 0x19e   : > { %v1852_v10 = vpop.eup %1851  ;;  %v625_v7 = vpop.f32.mrb[32].mxu0  ;;  %v920_v13 = vadd.f32 1.0, %v1850_v9  ;;  %1863 = verf.f32 %v799_v8 }
 0x19f   : > { %v2464_v14 = vadd.f32 %v625_v7, %v2355_v54  ;;  %v627_v15 = vpop.f32.mrb[33].mxu0  ;;  %v1854_v17 = vpop.eup %1853  ;;  %v921_v19 = vadd.f32 1.0, %v1852_v10  ;;  %1263 = vmatprep.mubr.bf16.mxu1 %v1035_v12 }
 0x1a0   : > { %v2468_v21 = vadd.f32 %v627_v15, %v2357_v55  ;;  %v629_v24 = vpop.f32.mrb[34].mxu0  ;;  %v1856_v25 = vpop.eup %1855  ;;  %v922_v30 = vadd.f32 1.0, %v1854_v17  ;;  %1264 = vmatmul.mubr.bf16.gmra.mrb[20].mxu1 %v1034_v11  ;;  %v984_v37 = vmul.f32 %v920_v13, %v728_v18 }
 0x1a1   : > { %v800_v31 = vmul.f32 0.70710677, %v2464_v14  ;;  %v631_v33 = vpop.f32.mrb[35].mxu0  ;;  %v923_v35 = vadd.f32 1.0, %v1856_v25  ;;  %v2476_v36 = vadd.f32 %v629_v24, %v2355_v54  ;;  %v985_v20 = vmul.f32 %v921_v19, %v729_v26 }
 0x1a2   : > { %v801_v16 = vmul.f32 0.70710677, %v2468_v21  ;;  %v986_v22 = vmul.f32 %v922_v30, %v730_v29  ;;  %v2479_v23 = vadd.f32 %v631_v33, %v2357_v55  ;;  %v736_v17 = vmul.f32 0.5, %v2464_v14 }
 0x1a3   : > { %1865 = verf.f32 %v800_v31  ;;  %v987_v28 = vmul.f32 %v923_v35, %v731_v34  ;;  %v802_v32 = vmul.f32 0.70710677, %v2476_v36  ;;  %v737_v26 = vmul.f32 0.5, %v2468_v21 }
 0x1a4   : > { %1867 = verf.f32 %v801_v16  ;;  %v803_v39 = vmul.f32 0.70710677, %v2479_v23  ;;  %v1036_v27 = vpack.c.bf16 %v986_v22, %v984_v37  ;;  %v738_v29 = vmul.f32 0.5, %v2476_v36 }
 0x1a5   : > { %v1858_v40 = vpop.eup %1857  ;;  %1869 = verf.f32 %v802_v32  ;;  %v1037_v38 = vpack.c.bf16 %v987_v28, %v985_v20  ;;  %v739_v34 = vmul.f32 0.5, %v2479_v23 }
 0x1a6   : > { %v1860_v41 = vpop.eup %1859  ;;  %v635_v42 = vpop.f32.mrb[36].mxu0  ;;  %v924_v43 = vadd.f32 1.0, %v1858_v40  ;;  %1871 = verf.f32 %v803_v39 }
 0x1a7   : > { %v2484_v44 = vadd.f32 %v635_v42, %v2355_v54  ;;  %v637_v45 = vpop.f32.mrb[37].mxu0  ;;  %v1862_v47 = vpop.eup %1861  ;;  %v925_v50 = vadd.f32 1.0, %v1860_v41  ;;  %1271 = vmatprep.mubr.bf16.mxu1 %v1037_v38 }
 0x1a8   : > { %v2488_v51 = vadd.f32 %v637_v45, %v2357_v55  ;;  %v639_v57 = vpop.f32.mrb[38].mxu0  ;;  %v1864_v58 = vpop.eup %1863  ;;  %v926_v62 = vadd.f32 1.0, %v1862_v47  ;;  %1272 = vmatmul.mubr.bf16.gmra.mrb[24].mxu1 %v1036_v27  ;;  %v988_v4 = vmul.f32 %v924_v43, %v732_v49 }
 0x1a9   : > { %v804_v63 = vmul.f32 0.70710677, %v2484_v44  ;;  %v641_v0 = vpop.f32.mrb[39].mxu0  ;;  %v927_v2 = vadd.f32 1.0, %v1864_v58  ;;  %v2496_v48 = vadd.f32 %v639_v57, %v2355_v54  ;;  %v989_v3 = vmul.f32 %v925_v50, %v733_v59 }
 0x1aa   : > { %v805_v46 = vmul.f32 0.70710677, %v2488_v51  ;;  %v990_v6 = vmul.f32 %v926_v62, %v734_v61  ;;  %v2499_v53 = vadd.f32 %v641_v0, %v2357_v55  ;;  %v740_v47 = vmul.f32 0.5, %v2484_v44 }
 0x1ab   : > { %1873 = verf.f32 %v804_v63  ;;  %v991_v52 = vmul.f32 %v927_v2, %v735_v1  ;;  %v806_v60 = vmul.f32 0.70710677, %v2496_v48  ;;  %v741_v59 = vmul.f32 0.5, %v2488_v51 }
 0x1ac   : > { %1875 = verf.f32 %v805_v46  ;;  %v807_v56 = vmul.f32 0.70710677, %v2499_v53  ;;  %v1038_v9 = vpack.c.bf16 %v990_v6, %v988_v4  ;;  %v742_v61 = vmul.f32 0.5, %v2496_v48 }
 0x1ad   : > { %v1866_v5 = vpop.eup %1865  ;;  %1877 = verf.f32 %v806_v60  ;;  %v1039_v10 = vpack.c.bf16 %v991_v52, %v989_v3  ;;  %v743_v1 = vmul.f32 0.5, %v2499_v53 }
 0x1ae   : > { %v1868_v8 = vpop.eup %1867  ;;  %v645_v11 = vpop.f32.mrb[40].mxu0  ;;  %v928_v7 = vadd.f32 1.0, %v1866_v5  ;;  %1879 = verf.f32 %v807_v56 }
 0x1af   : > { %v2504_v12 = vadd.f32 %v645_v11, %v2355_v54  ;;  %v647_v13 = vpop.f32.mrb[41].mxu0  ;;  %v1870_v15 = vpop.eup %1869  ;;  %v929_v18 = vadd.f32 1.0, %v1868_v8  ;;  %1279 = vmatprep.mubr.bf16.mxu1 %v1039_v10 }
 0x1b0   : > { %v2508_v19 = vadd.f32 %v647_v13, %v2357_v55  ;;  %v649_v24 = vpop.f32.mrb[42].mxu0  ;;  %v1872_v25 = vpop.eup %1871  ;;  %v930_v30 = vadd.f32 1.0, %v1870_v15  ;;  %1280 = vmatmul.mubr.bf16.gmra.mrb[28].mxu1 %v1038_v9  ;;  %v992_v37 = vmul.f32 %v928_v7, %v736_v17 }
 0x1b1   : > { %v808_v31 = vmul.f32 0.70710677, %v2504_v12  ;;  %v651_v33 = vpop.f32.mrb[43].mxu0  ;;  %v931_v35 = vadd.f32 1.0, %v1872_v25  ;;  %v2516_v16 = vadd.f32 %v649_v24, %v2355_v54  ;;  %v993_v36 = vmul.f32 %v929_v18, %v737_v26 }
 0x1b2   : > { %v809_v14 = vmul.f32 0.70710677, %v2508_v19  ;;  %v994_v22 = vmul.f32 %v930_v30, %v738_v29  ;;  %v2519_v21 = vadd.f32 %v651_v33, %v2357_v55  ;;  %v744_v15 = vmul.f32 0.5, %v2504_v12 }
 0x1b3   : > { %1881 = verf.f32 %v808_v31  ;;  %v995_v20 = vmul.f32 %v931_v35, %v739_v34  ;;  %v810_v28 = vmul.f32 0.70710677, %v2516_v16  ;;  %v745_v26 = vmul.f32 0.5, %v2508_v19 }
 0x1b4   : > { %1883 = verf.f32 %v809_v14  ;;  %v811_v23 = vmul.f32 0.70710677, %v2519_v21  ;;  %v1040_v40 = vpack.c.bf16 %v994_v22, %v992_v37  ;;  %v746_v29 = vmul.f32 0.5, %v2516_v16 }
 0x1b5   : > { %v1874_v32 = vpop.eup %1873  ;;  %1885 = verf.f32 %v810_v28  ;;  %v1041_v41 = vpack.c.bf16 %v995_v20, %v993_v36  ;;  %v747_v34 = vmul.f32 0.5, %v2519_v21 }
 0x1b6   : > { %v1876_v39 = vpop.eup %1875  ;;  %v655_v27 = vpop.f32.mrb[44].mxu0  ;;  %v932_v42 = vadd.f32 1.0, %v1874_v32  ;;  %1887 = verf.f32 %v811_v23 }
 0x1b7   : > { %v2524_v38 = vadd.f32 %v655_v27, %v2355_v54  ;;  %v657_v43 = vpop.f32.mrb[45].mxu0  ;;  %v1878_v45 = vpop.eup %1877  ;;  %v933_v49 = vadd.f32 1.0, %v1876_v39  ;;  %1287 = vmatprep.mubr.bf16.mxu1 %v1041_v41 }
 0x1b8   : > { %v2528_v50 = vadd.f32 %v657_v43, %v2357_v55  ;;  %v659_v57 = vpop.f32.mrb[46].mxu0  ;;  %v1880_v58 = vpop.eup %1879  ;;  %v934_v62 = vadd.f32 1.0, %v1878_v45  ;;  %1288 = vmatmul.mubr.bf16.gmra.mrb[32].mxu1 %v1040_v40  ;;  %v996_v4 = vmul.f32 %v932_v42, %v740_v47 }
 0x1b9   : > { %v812_v63 = vmul.f32 0.70710677, %v2524_v38  ;;  %v661_v0 = vpop.f32.mrb[47].mxu0  ;;  %v935_v2 = vadd.f32 1.0, %v1880_v58  ;;  %v2536_v46 = vadd.f32 %v659_v57, %v2355_v54  ;;  %v997_v48 = vmul.f32 %v933_v49, %v741_v59 }
 0x1ba   : > { %v813_v44 = vmul.f32 0.70710677, %v2528_v50  ;;  %v998_v6 = vmul.f32 %v934_v62, %v742_v61  ;;  %v2539_v51 = vadd.f32 %v661_v0, %v2357_v55  ;;  %v748_v45 = vmul.f32 0.5, %v2524_v38 }
 0x1bb   : > { %1889 = verf.f32 %v812_v63  ;;  %v999_v3 = vmul.f32 %v935_v2, %v743_v1  ;;  %v814_v52 = vmul.f32 0.70710677, %v2536_v46  ;;  %v749_v59 = vmul.f32 0.5, %v2528_v50 }
 0x1bc   : > { %1891 = verf.f32 %v813_v44  ;;  %v815_v53 = vmul.f32 0.70710677, %v2539_v51  ;;  %v1042_v5 = vpack.c.bf16 %v998_v6, %v996_v4  ;;  %v750_v61 = vmul.f32 0.5, %v2536_v46 }
 0x1bd   : > { %v1882_v60 = vpop.eup %1881  ;;  %1893 = verf.f32 %v814_v52  ;;  %v1043_v8 = vpack.c.bf16 %v999_v3, %v997_v48  ;;  %v751_v1 = vmul.f32 0.5, %v2539_v51 }
 0x1be   : > { %v1884_v56 = vpop.eup %1883  ;;  %v665_v9 = vpop.f32.mrb[48].mxu0  ;;  %v936_v11 = vadd.f32 1.0, %v1882_v60  ;;  %1895 = verf.f32 %v815_v53 }
 0x1bf   : > { %v2544_v10 = vadd.f32 %v665_v9, %v2355_v54  ;;  %v667_v7 = vpop.f32.mrb[49].mxu0  ;;  %v1886_v13 = vpop.eup %1885  ;;  %v937_v17 = vadd.f32 1.0, %v1884_v56  ;;  %1295 = vmatprep.mubr.bf16.mxu1 %v1043_v8 }
 0x1c0   : > { %v2548_v18 = vadd.f32 %v667_v7, %v2357_v55  ;;  %v669_v24 = vpop.f32.mrb[50].mxu0  ;;  %v1888_v25 = vpop.eup %1887  ;;  %v938_v30 = vadd.f32 1.0, %v1886_v13  ;;  %1296 = vmatmul.mubr.bf16.gmra.mrb[36].mxu1 %v1042_v5  ;;  %v1000_v37 = vmul.f32 %v936_v11, %v744_v15 }
 0x1c1   : > { %v816_v31 = vmul.f32 0.70710677, %v2544_v10  ;;  %v671_v33 = vpop.f32.mrb[51].mxu0  ;;  %v939_v35 = vadd.f32 1.0, %v1888_v25  ;;  %v2556_v14 = vadd.f32 %v669_v24, %v2355_v54  ;;  %v1001_v16 = vmul.f32 %v937_v17, %v745_v26 }
 0x1c2   : > { %v817_v12 = vmul.f32 0.70710677, %v2548_v18  ;;  %v1002_v22 = vmul.f32 %v938_v30, %v746_v29  ;;  %v2559_v19 = vadd.f32 %v671_v33, %v2357_v55  ;;  %v752_v13 = vmul.f32 0.5, %v2544_v10 }
 0x1c3   : > { %1897 = verf.f32 %v816_v31  ;;  %v1003_v36 = vmul.f32 %v939_v35, %v747_v34  ;;  %v818_v20 = vmul.f32 0.70710677, %v2556_v14  ;;  %v753_v26 = vmul.f32 0.5, %v2548_v18 }
 0x1c4   : > { %1899 = verf.f32 %v817_v12  ;;  %v819_v21 = vmul.f32 0.70710677, %v2559_v19  ;;  %v1044_v32 = vpack.c.bf16 %v1002_v22, %v1000_v37  ;;  %v754_v29 = vmul.f32 0.5, %v2556_v14 }
 0x1c5   : > { %v1890_v28 = vpop.eup %1889  ;;  %1901 = verf.f32 %v818_v20  ;;  %v1045_v39 = vpack.c.bf16 %v1003_v36, %v1001_v16  ;;  %v755_v34 = vmul.f32 0.5, %v2559_v19 }
 0x1c6   : > { %v1892_v23 = vpop.eup %1891  ;;  %v675_v40 = vpop.f32.mrb[52].mxu0  ;;  %v940_v27 = vadd.f32 1.0, %v1890_v28  ;;  %1903 = verf.f32 %v819_v21 }
 0x1c7   : > { %v2564_v41 = vadd.f32 %v675_v40, %v2355_v54  ;;  %v677_v42 = vpop.f32.mrb[53].mxu0  ;;  %v1894_v43 = vpop.eup %1893  ;;  %v941_v47 = vadd.f32 1.0, %v1892_v23  ;;  %1303 = vmatprep.mubr.bf16.mxu1 %v1045_v39 }
 0x1c8   : > { %v2568_v49 = vadd.f32 %v677_v42, %v2357_v55  ;;  %v679_v57 = vpop.f32.mrb[54].mxu0  ;;  %v1896_v58 = vpop.eup %1895  ;;  %v942_v62 = vadd.f32 1.0, %v1894_v43  ;;  %1304 = vmatmul.mubr.bf16.gmra.mrb[40].mxu1 %v1044_v32  ;;  %v1004_v4 = vmul.f32 %v940_v27, %v748_v45 }
 0x1c9   : > { %v820_v63 = vmul.f32 0.70710677, %v2564_v41  ;;  %v681_v0 = vpop.f32.mrb[55].mxu0  ;;  %v943_v2 = vadd.f32 1.0, %v1896_v58  ;;  %v2576_v44 = vadd.f32 %v679_v57, %v2355_v54  ;;  %v1005_v46 = vmul.f32 %v941_v47, %v749_v59 }
 0x1ca   : > { %v821_v38 = vmul.f32 0.70710677, %v2568_v49  ;;  %v1006_v6 = vmul.f32 %v942_v62, %v750_v61  ;;  %v2579_v50 = vadd.f32 %v681_v0, %v2357_v55  ;;  %v756_v43 = vmul.f32 0.5, %v2564_v41 }
 0x1cb   : > { %1905 = verf.f32 %v820_v63  ;;  %v1007_v48 = vmul.f32 %v943_v2, %v751_v1  ;;  %v822_v3 = vmul.f32 0.70710677, %v2576_v44  ;;  %v757_v59 = vmul.f32 0.5, %v2568_v49 }
 0x1cc   : > { %1907 = verf.f32 %v821_v38  ;;  %v823_v51 = vmul.f32 0.70710677, %v2579_v50  ;;  %v1046_v60 = vpack.c.bf16 %v1006_v6, %v1004_v4  ;;  %v758_v61 = vmul.f32 0.5, %v2576_v44 }
 0x1cd   : > { %v1898_v52 = vpop.eup %1897  ;;  %1909 = verf.f32 %v822_v3  ;;  %v1047_v56 = vpack.c.bf16 %v1007_v48, %v1005_v46  ;;  %v759_v1 = vmul.f32 0.5, %v2579_v50 }
 0x1ce   : > { %v1900_v53 = vpop.eup %1899  ;;  %v685_v5 = vpop.f32.mrb[56].mxu0  ;;  %v944_v9 = vadd.f32 1.0, %v1898_v52  ;;  %1911 = verf.f32 %v823_v51 }
 0x1cf   : > { %v2584_v8 = vadd.f32 %v685_v5, %v2355_v54  ;;  %v687_v11 = vpop.f32.mrb[57].mxu0  ;;  %v1902_v7 = vpop.eup %1901  ;;  %v945_v15 = vadd.f32 1.0, %v1900_v53  ;;  %1311 = vmatprep.mubr.bf16.mxu1 %v1047_v56 }
 0x1d0   : > { %v2588_v17 = vadd.f32 %v687_v11, %v2357_v55  ;;  %v689_v24 = vpop.f32.mrb[58].mxu0  ;;  %v1904_v25 = vpop.eup %1903  ;;  %v946_v30 = vadd.f32 1.0, %v1902_v7  ;;  %1312 = vmatmul.mubr.bf16.gmra.mrb[44].mxu1 %v1046_v60  ;;  %v1008_v37 = vmul.f32 %v944_v9, %v752_v13 }
 0x1d1   : > { %v824_v31 = vmul.f32 0.70710677, %v2584_v8  ;;  %v691_v33 = vpop.f32.mrb[59].mxu0  ;;  %v947_v35 = vadd.f32 1.0, %v1904_v25  ;;  %v690_v12 = vadd.f32 %v689_v24, %v2355_v54  ;;  %v1009_v18 = vmul.f32 %v945_v15, %v753_v26 }
 0x1d2   : > { %v825_v10 = vmul.f32 0.70710677, %v2588_v17  ;;  %v1010_v22 = vmul.f32 %v946_v30, %v754_v29  ;;  %v692_v16 = vadd.f32 %v691_v33, %v2357_v55  ;;  %v760_v9 = vmul.f32 0.5, %v2584_v8 }
 0x1d3   : > { %1913 = verf.f32 %v824_v31  ;;  %v1011_v36 = vmul.f32 %v947_v35, %v755_v34  ;;  %v826_v14 = vmul.f32 0.70710677, %v690_v12  ;;  %v762_v11 = vmul.f32 0.5, %v690_v12 }
 0x1d4   : > { %1915 = verf.f32 %v825_v10  ;;  %v827_v28 = vmul.f32 0.70710677, %v692_v16  ;;  %v1048_v21 = vpack.c.bf16 %v1010_v22, %v1008_v37  ;;  %v761_v7 = vmul.f32 0.5, %v2588_v17 }
 0x1d5   : > { %v1906_v20 = vpop.eup %1905  ;;  %1917 = verf.f32 %v826_v14  ;;  %v1049_v23 = vpack.c.bf16 %v1011_v36, %v1009_v18  ;;  %v763_v13 = vmul.f32 0.5, %v692_v16 }
 0x1d6   : > { %v1908_v32 = vpop.eup %1907  ;;  %v695_v19 = vpop.f32.mrb[60].mxu0  ;;  %v948_v40 = vadd.f32 1.0, %v1906_v20  ;;  %1919 = verf.f32 %v827_v28 }
 0x1d7   : > { %v696_v39 = vadd.f32 %v695_v19, %v2355_v54  ;;  %v697_v27 = vpop.f32.mrb[61].mxu0  ;;  %v1910_v42 = vpop.eup %1909  ;;  %v949_v45 = vadd.f32 1.0, %v1908_v32  ;;  %1319 = vmatprep.mubr.bf16.mxu1 %v1049_v23 }
 0x1d8   : > { %v698_v47 = vadd.f32 %v697_v27, %v2357_v55  ;;  %v699_v57 = vpop.f32.mrb[62].mxu0  ;;  %v1912_v58 = vpop.eup %1911  ;;  %v950_v62 = vadd.f32 1.0, %v1910_v42  ;;  %1320 = vmatmul.mubr.bf16.gmra.mrb[48].mxu1 %v1048_v21  ;;  %v1012_v4 = vmul.f32 %v948_v40, %v756_v43  ;;  %v2611_v40 = vld [vmem:[%s2734_s4] ss:$0 sm:$0xff] }
 0x1d9   : > { %v828_v63 = vmul.f32 0.70710677, %v696_v39  ;;  %v701_v0 = vpop.f32.mrb[63].mxu0  ;;  %v951_v2 = vadd.f32 1.0, %v1912_v58  ;;  %v700_v41 = vadd.f32 %v699_v57, %v2355_v54  ;;  %v1013_v48 = vmul.f32 %v949_v45, %v757_v59 }
 0x1da   : > { %v829_v38 = vmul.f32 0.70710677, %v698_v47  ;;  %v1014_v6 = vmul.f32 %v950_v62, %v758_v61  ;;  %v702_v46 = vadd.f32 %v701_v0, %v2357_v55  ;;  %v764_v12 = vmul.f32 0.5, %v696_v39 }
 0x1db   : > { %1921 = verf.f32 %v828_v63  ;;  %v1015_v3 = vmul.f32 %v951_v2, %v759_v1  ;;  %v830_v49 = vmul.f32 0.70710677, %v700_v41  ;;  %v766_v22 = vmul.f32 0.5, %v700_v41 }
 0x1dc   : > { %1923 = verf.f32 %v829_v38  ;;  %v831_v52 = vmul.f32 0.70710677, %v702_v46  ;;  %v1050_v51 = vpack.c.bf16 %v1014_v6, %v1012_v4  ;;  %v765_v17 = vmul.f32 0.5, %v698_v47 }
 0x1dd   : > { %v1914_v44 = vpop.eup %1913  ;;  %1925 = verf.f32 %v830_v49  ;;  %v1051_v53 = vpack.c.bf16 %v1015_v3, %v1013_v48  ;;  %v767_v16 = vmul.f32 0.5, %v702_v46 }
 0x1de   : > { %v1916_v60 = vpop.eup %1915  ;;  %v952_v50 = vadd.f32 1.0, %v1914_v44  ;;  %1927 = verf.f32 %v831_v52 }
 0x1df   : > { %v1918_v5 = vpop.eup %1917  ;;  %v953_v56 = vadd.f32 1.0, %v1916_v60  ;;  %1327 = vmatprep.mubr.bf16.mxu1 %v1051_v53 }
 0x1e0   : > { %v1920_v54 = vpop.eup %1919  ;;  %v954_v55 = vadd.f32 1.0, %v1918_v5  ;;  %1328 = vmatmul.mubr.bf16.gmra.mrb[52].mxu1 %v1050_v51  ;;  %v1016_v24 = vmul.f32 %v952_v50, %v760_v9 }
 0x1e1   : > { %v955_v15 = vadd.f32 1.0, %v1920_v54  ;;  %v1017_v26 = vmul.f32 %v953_v56, %v761_v7 }
 0x1e2   : > { %v1018_v25 = vmul.f32 %v954_v55, %v762_v11 }
 0x1e3   : > { %v1019_v29 = vmul.f32 %v955_v15, %v763_v13 }
 0x1e4   : > { %v1052_v31 = vpack.c.bf16 %v1018_v25, %v1016_v24 }
 0x1e5   : > { %v1922_v30 = vpop.eup %1921  ;;  %v1053_v34 = vpack.c.bf16 %v1019_v29, %v1017_v26 }
 0x1e6   : > { %v1924_v33 = vpop.eup %1923  ;;  %v956_v35 = vadd.f32 1.0, %v1922_v30 }
 0x1e7   : > { %v1926_v10 = vpop.eup %1925  ;;  %v957_v37 = vadd.f32 1.0, %v1924_v33  ;;  %1335 = vmatprep.mubr.bf16.mxu1 %v1053_v34 }
 0x1e8   : > { %v1928_v8 = vpop.eup %1927  ;;  %v958_v18 = vadd.f32 1.0, %v1926_v10  ;;  %1336 = vmatmul.mubr.bf16.gmra.mrb[56].mxu1 %v1052_v31  ;;  %v1020_v14 = vmul.f32 %v956_v35, %v764_v12 }
 0x1e9   : > { %v959_v36 = vadd.f32 1.0, %v1928_v8  ;;  %v1021_v28 = vmul.f32 %v957_v37, %v765_v17 }
 0x1ea   : > { %v1022_v20 = vmul.f32 %v958_v18, %v766_v22 }
 0x1eb   : > { %v1023_v21 = vmul.f32 %v959_v36, %v767_v16 }
 0x1ec   : > { %v1054_v32 = vpack.c.bf16 %v1022_v20, %v1020_v14 }
 0x1ed   : > { %v1055_v19 = vpack.c.bf16 %v1023_v21, %v1021_v28 }
 0x1ef   : > { %1343 = vmatprep.mubr.bf16.mxu1 %v1055_v19 }
 0x1f0   : > { %1344 = vmatmul.mubr.bf16.gmra.mrb[60].mxu1 %v1054_v32 }
 0x24b   : > { %v1575_v23 = vpop.f32.mrb[0].mxu1 }
 0x24c   : > { %v1576_v39 = vpop.f32.mrb[1].mxu1 }
 0x24d   : > { %v1577_v27 = vadd.f32 %v1576_v39, %v1575_v23  ;;  %v1578_v42 = vpop.f32.mrb[2].mxu1 }
 0x24e   : > { %v1579_v43 = vpop.f32.mrb[3].mxu1 }
 0x24f   : > { %v1226_v45 = vadd.f32 %v1577_v27, %v2611_v40  ;;  %v1580_v47 = vadd.f32 %v1579_v43, %v1578_v42 }
 0x251   : > { %1352 = vst [vmem:[%s2614_s28] sm:$0xff] %v1226_v45  ;;  %v1229_v57 = vadd.f32 %v1580_v47, %v2611_v40 }
 0x253   : > { %1353 = vst [vmem:[%s2614_s28 + $0x8] sm:$0xff] %v1229_v57  ;;  %v1581_v58 = vpop.f32.mrb[4].mxu1 }
 0x254   : > { %v1582_v59 = vpop.f32.mrb[5].mxu1 }
 0x255   : > { %v1583_v61 = vadd.f32 %v1582_v59, %v1581_v58  ;;  %v1584_v62 = vpop.f32.mrb[6].mxu1 }
 0x256   : > { %v1585_v63 = vpop.f32.mrb[7].mxu1 }
 0x257   : > { %v1234_v0 = vadd.f32 %v1583_v61, %v2611_v40  ;;  %v1586_v1 = vadd.f32 %v1585_v63, %v1584_v62 }
 0x259   : > { %1354 = vst [vmem:[%s2614_s28 + $0x10] sm:$0xff] %v1234_v0  ;;  %v1237_v2 = vadd.f32 %v1586_v1, %v2611_v40 }
 0x25b   : > { %1355 = vst [vmem:[%s2614_s28 + $0x18] sm:$0xff] %v1237_v2  ;;  %v1587_v38 = vpop.f32.mrb[8].mxu1 }
 0x25c   : > { %v1588_v41 = vpop.f32.mrb[9].mxu1 }
 0x25d   : > { %v1589_v4 = vadd.f32 %v1588_v41, %v1587_v38  ;;  %v1590_v6 = vpop.f32.mrb[10].mxu1 }
 0x25e   : > { %v1591_v46 = vpop.f32.mrb[11].mxu1 }
 0x25f   : > { %v1242_v48 = vadd.f32 %v1589_v4, %v2611_v40  ;;  %v1592_v3 = vadd.f32 %v1591_v46, %v1590_v6 }
 0x261   : > { %1356 = vst [vmem:[%s2614_s28 + $0x20] sm:$0xff] %v1242_v48  ;;  %v1245_v49 = vadd.f32 %v1592_v3, %v2611_v40 }
 0x263   : > { %1357 = vst [vmem:[%s2614_s28 + $0x28] sm:$0xff] %v1245_v49  ;;  %v1593_v44 = vpop.f32.mrb[12].mxu1 }
 0x264   : > { %v1594_v52 = vpop.f32.mrb[13].mxu1 }
 0x265   : > { %v1595_v51 = vadd.f32 %v1594_v52, %v1593_v44  ;;  %v1596_v60 = vpop.f32.mrb[14].mxu1 }
 0x266   : > { %v1597_v53 = vpop.f32.mrb[15].mxu1 }
 0x267   : > { %v1250_v50 = vadd.f32 %v1595_v51, %v2611_v40  ;;  %v1598_v5 = vadd.f32 %v1597_v53, %v1596_v60 }
 0x269   : > { %1358 = vst [vmem:[%s2614_s28 + $0x30] sm:$0xff] %v1250_v50  ;;  %v1253_v56 = vadd.f32 %v1598_v5, %v2611_v40 }
 0x26b   : > { %1359 = vst [vmem:[%s2614_s28 + $0x38] sm:$0xff] %v1253_v56  ;;  %v1599_v54 = vpop.f32.mrb[16].mxu1 }
 0x26c   : > { %v1600_v9 = vpop.f32.mrb[17].mxu1 }
 0x26d   : > { %v1601_v11 = vadd.f32 %v1600_v9, %v1599_v54  ;;  %v1602_v55 = vpop.f32.mrb[18].mxu1 }
 0x26e   : > { %v1603_v7 = vpop.f32.mrb[19].mxu1 }
 0x26f   : > { %v1258_v13 = vadd.f32 %v1601_v11, %v2611_v40  ;;  %v1604_v15 = vadd.f32 %v1603_v7, %v1602_v55 }
 0x271   : > { %1360 = vst [vmem:[%s2614_s28 + $0x40] sm:$0xff] %v1258_v13  ;;  %v1261_v24 = vadd.f32 %v1604_v15, %v2611_v40 }
 0x273   : > { %1361 = vst [vmem:[%s2614_s28 + $0x48] sm:$0xff] %v1261_v24  ;;  %v1605_v25 = vpop.f32.mrb[20].mxu1 }
 0x274   : > { %v1606_v26 = vpop.f32.mrb[21].mxu1 }
 0x275   : > { %v1607_v29 = vadd.f32 %v1606_v26, %v1605_v25  ;;  %v1608_v30 = vpop.f32.mrb[22].mxu1 }
 0x276   : > { %v1609_v31 = vpop.f32.mrb[23].mxu1 }
 0x277   : > { %v1266_v33 = vadd.f32 %v1607_v29, %v2611_v40  ;;  %v1610_v34 = vadd.f32 %v1609_v31, %v1608_v30 }
 0x279   : > { %1362 = vst [vmem:[%s2614_s28 + $0x50] sm:$0xff] %v1266_v33  ;;  %v1269_v35 = vadd.f32 %v1610_v34, %v2611_v40 }
 0x27b   : > { %1363 = vst [vmem:[%s2614_s28 + $0x58] sm:$0xff] %v1269_v35  ;;  %v1611_v10 = vpop.f32.mrb[24].mxu1 }
 0x27c   : > { %v1612_v37 = vpop.f32.mrb[25].mxu1 }
 0x27d   : > { %v1613_v8 = vadd.f32 %v1612_v37, %v1611_v10  ;;  %v1614_v12 = vpop.f32.mrb[26].mxu1 }
 0x27e   : > { %v1615_v22 = vpop.f32.mrb[27].mxu1 }
 0x27f   : > { %v1274_v18 = vadd.f32 %v1613_v8, %v2611_v40  ;;  %v1616_v17 = vadd.f32 %v1615_v22, %v1614_v12 }
 0x281   : > { %1364 = vst [vmem:[%s2614_s28 + $0x60] sm:$0xff] %v1274_v18  ;;  %v1277_v16 = vadd.f32 %v1616_v17, %v2611_v40 }
 0x283   : > { %1365 = vst [vmem:[%s2614_s28 + $0x68] sm:$0xff] %v1277_v16  ;;  %v1617_v36 = vpop.f32.mrb[28].mxu1 }
 0x284   : > { %v1618_v14 = vpop.f32.mrb[29].mxu1 }
 0x285   : > { %v1619_v20 = vadd.f32 %v1618_v14, %v1617_v36  ;;  %v1620_v28 = vpop.f32.mrb[30].mxu1 }
 0x286   : > { %v1621_v21 = vpop.f32.mrb[31].mxu1 }
 0x287   : > { %v1282_v32 = vadd.f32 %v1619_v20, %v2611_v40  ;;  %v1622_v19 = vadd.f32 %v1621_v21, %v1620_v28 }
 0x289   : > { %1366 = vst [vmem:[%s2614_s28 + $0x70] sm:$0xff] %v1282_v32  ;;  %v1285_v23 = vadd.f32 %v1622_v19, %v2611_v40 }
 0x28b   : > { %1367 = vst [vmem:[%s2614_s28 + $0x78] sm:$0xff] %v1285_v23  ;;  %v1623_v39 = vpop.f32.mrb[32].mxu1 }
 0x28c   : > { %v1624_v27 = vpop.f32.mrb[33].mxu1 }
 0x28d   : > { %v1625_v42 = vadd.f32 %v1624_v27, %v1623_v39  ;;  %v1626_v43 = vpop.f32.mrb[34].mxu1 }
 0x28e   : > { %v1627_v45 = vpop.f32.mrb[35].mxu1 }
 0x28f   : > { %v1290_v47 = vadd.f32 %v1625_v42, %v2611_v40  ;;  %v1628_v57 = vadd.f32 %v1627_v45, %v1626_v43 }
 0x291   : > { %1368 = vst [vmem:[%s2614_s28 + $0x80] sm:$0xff] %v1290_v47  ;;  %v1293_v58 = vadd.f32 %v1628_v57, %v2611_v40 }
 0x293   : > { %1369 = vst [vmem:[%s2614_s28 + $0x88] sm:$0xff] %v1293_v58  ;;  %v1629_v59 = vpop.f32.mrb[36].mxu1 }
 0x294   : > { %v1630_v61 = vpop.f32.mrb[37].mxu1 }
 0x295   : > { %v1631_v62 = vadd.f32 %v1630_v61, %v1629_v59  ;;  %v1632_v63 = vpop.f32.mrb[38].mxu1 }
 0x296   : > { %v1633_v0 = vpop.f32.mrb[39].mxu1 }
 0x297   : > { %v1298_v1 = vadd.f32 %v1631_v62, %v2611_v40  ;;  %v1634_v2 = vadd.f32 %v1633_v0, %v1632_v63 }
 0x299   : > { %1370 = vst [vmem:[%s2614_s28 + $0x90] sm:$0xff] %v1298_v1  ;;  %v1301_v38 = vadd.f32 %v1634_v2, %v2611_v40 }
 0x29b   : > { %1371 = vst [vmem:[%s2614_s28 + $0x98] sm:$0xff] %v1301_v38  ;;  %v1635_v41 = vpop.f32.mrb[40].mxu1 }
 0x29c   : > { %v1636_v4 = vpop.f32.mrb[41].mxu1 }
 0x29d   : > { %v1637_v6 = vadd.f32 %v1636_v4, %v1635_v41  ;;  %v1638_v46 = vpop.f32.mrb[42].mxu1 }
 0x29e   : > { %v1639_v48 = vpop.f32.mrb[43].mxu1 }
 0x29f   : > { %v1306_v3 = vadd.f32 %v1637_v6, %v2611_v40  ;;  %v1640_v49 = vadd.f32 %v1639_v48, %v1638_v46 }
 0x2a1   : > { %1372 = vst [vmem:[%s2614_s28 + $0xa0] sm:$0xff] %v1306_v3  ;;  %v1309_v44 = vadd.f32 %v1640_v49, %v2611_v40 }
 0x2a3   : > { %1373 = vst [vmem:[%s2614_s28 + $0xa8] sm:$0xff] %v1309_v44  ;;  %v1641_v52 = vpop.f32.mrb[44].mxu1 }
 0x2a4   : > { %v1642_v51 = vpop.f32.mrb[45].mxu1 }
 0x2a5   : > { %v1643_v60 = vadd.f32 %v1642_v51, %v1641_v52  ;;  %v1644_v53 = vpop.f32.mrb[46].mxu1 }
 0x2a6   : > { %v1645_v50 = vpop.f32.mrb[47].mxu1 }
 0x2a7   : > { %v1314_v5 = vadd.f32 %v1643_v60, %v2611_v40  ;;  %v1646_v56 = vadd.f32 %v1645_v50, %v1644_v53 }
 0x2a9   : > { %1374 = vst [vmem:[%s2614_s28 + $0xb0] sm:$0xff] %v1314_v5  ;;  %v1317_v54 = vadd.f32 %v1646_v56, %v2611_v40 }
 0x2ab   : > { %1375 = vst [vmem:[%s2614_s28 + $0xb8] sm:$0xff] %v1317_v54  ;;  %v1647_v9 = vpop.f32.mrb[48].mxu1 }
 0x2ac   : > { %v1648_v11 = vpop.f32.mrb[49].mxu1 }
 0x2ad   : > { %v1649_v55 = vadd.f32 %v1648_v11, %v1647_v9  ;;  %v1650_v7 = vpop.f32.mrb[50].mxu1 }
 0x2ae   : > { %v1651_v13 = vpop.f32.mrb[51].mxu1 }
 0x2af   : > { %v1322_v15 = vadd.f32 %v1649_v55, %v2611_v40  ;;  %v1652_v24 = vadd.f32 %v1651_v13, %v1650_v7 }
 0x2b1   : > { %1376 = vst [vmem:[%s2614_s28 + $0xc0] sm:$0xff] %v1322_v15  ;;  %v1325_v25 = vadd.f32 %v1652_v24, %v2611_v40 }
 0x2b3   : > { %1377 = vst [vmem:[%s2614_s28 + $0xc8] sm:$0xff] %v1325_v25  ;;  %v1653_v26 = vpop.f32.mrb[52].mxu1 }
 0x2b4   : > { %v1654_v29 = vpop.f32.mrb[53].mxu1 }
 0x2b5   : > { %v1655_v30 = vadd.f32 %v1654_v29, %v1653_v26  ;;  %v1656_v31 = vpop.f32.mrb[54].mxu1 }
 0x2b6   : > { %v1657_v33 = vpop.f32.mrb[55].mxu1 }
 0x2b7   : > { %v1330_v34 = vadd.f32 %v1655_v30, %v2611_v40  ;;  %v1658_v35 = vadd.f32 %v1657_v33, %v1656_v31 }
 0x2b9   : > { %1378 = vst [vmem:[%s2614_s28 + $0xd0] sm:$0xff] %v1330_v34  ;;  %v1333_v10 = vadd.f32 %v1658_v35, %v2611_v40 }
 0x2bb   : > { %1379 = vst [vmem:[%s2614_s28 + $0xd8] sm:$0xff] %v1333_v10  ;;  %v1659_v37 = vpop.f32.mrb[56].mxu1 }
 0x2bc   : > { %v1660_v8 = vpop.f32.mrb[57].mxu1 }
 0x2bd   : > { %v1661_v12 = vadd.f32 %v1660_v8, %v1659_v37  ;;  %v1662_v22 = vpop.f32.mrb[58].mxu1 }
 0x2be   : > { %v1663_v18 = vpop.f32.mrb[59].mxu1 }
 0x2bf   : > { %v1338_v17 = vadd.f32 %v1661_v12, %v2611_v40  ;;  %v1664_v16 = vadd.f32 %v1663_v18, %v1662_v22 }
 0x2c1   : > { %1380 = vst [vmem:[%s2614_s28 + $0xe0] sm:$0xff] %v1338_v17  ;;  %v1341_v36 = vadd.f32 %v1664_v16, %v2611_v40 }
 0x2c3   : > { %1381 = vst [vmem:[%s2614_s28 + $0xe8] sm:$0xff] %v1341_v36  ;;  %v1665_v14 = vpop.f32.mrb[60].mxu1 }
 0x2c4   : > { %v1666_v20 = vpop.f32.mrb[61].mxu1 }
 0x2c5   : > { %v1667_v28 = vadd.f32 %v1666_v20, %v1665_v14  ;;  %v1668_v21 = vpop.f32.mrb[62].mxu1 }
 0x2c6   : > { %v1669_v32 = vpop.f32.mrb[63].mxu1 }
 0x2c7   : > { %v1346_v19 = vadd.f32 %v1667_v28, %v2611_v40  ;;  %v1670_v23 = vadd.f32 %v1669_v32, %v1668_v21 }
 0x2c9   : > { %1382 = vst [vmem:[%s2614_s28 + $0xf0] sm:$0xff] %v1346_v19  ;;  %v1349_v39 = vadd.f32 %v1670_v23, %v2611_v40 }
 0x2cb   : > { %1383 = vst [vmem:[%s2614_s28 + $0xf8] sm:$0xff] %v1349_v39 }
 0x2cc   : > { %2028 = shalt.err (!%p2025_p2)
}
 0x2cd   : > { %s2029_s24 = scalar_lea.hbm %s2681_s23, 4096  ;;  %s2033_s13 = scalar_lea.hbm %s2735_s5, 8192 }
 0x2ce   : > { %p2030_p13 = scmp.ne.s32.totalorder %s2681_s23, %s2029_s24  ;;  %p2034_p4 = scmp.lt.u32.totalorder %s2681_s23, %s2735_s5 }
 0x2cf   : > { %p2035_p7 = scmp.lt.u32.totalorder %s2033_s13, %s2029_s24  ;;  %p2037_p11 = scmp.lt.u32.totalorder %s2029_s24, %s2681_s23 }
 0x2d0   : > { %p2031_p6 = pnand %p2030_p13, %p2749_p0 }
 0x2d1   : > { %p2036_p8 = por %p2035_p7, %p2034_p4 }
 0x2d2   : > { %p2032_p10 = pneg %p2031_p6 }
 0x2d3   : > { %p2038_p1 = por %p2037_p11, %p2036_p8 }
 0x2d5   : > { %p2039_p3 = pnand %p2038_p1, %p2032_p10 }
 0x2d7   : > { %2042 = shalt.err (!%p2039_p3)
}
 0x2d8   : > { %s2096_s14 = smov 128   ;;  %s2097_s30 = smov 8  }
 0x2d9   : > { %1681 = dma.vmem_to_hbm [thread:$0]  (%p2749_p0), %s2683_s15, 4096, %s2681_s23, %s1385_s22, %s2096_s14, %s2096_s14, %s2097_s30  }
 0x2da PF: > { %s1413_s11 = sand.u32 1, %s2073_s18   ;;  %p2750_p5 = scmp.ne.s32.totalorder %s2740_s25, 0 }
 0x2db   : > { %p2751_p9 = scmp.ge.s32.totalorder %s2085_s21, 2  ;;  %s1414_s7 = scalar_lea.sflag [#allocation4], %s1413_s11 }
 0x2dd   : > { %p1695_p12 = pnand %p2751_p9, %p2750_p5 }
 0x2df   : > { %2068 = dma.done.wait (!%p1695_p12), %s1414_s7, 4096  }
 0x2e0   : > { %2070 = vsyncadd (!%p1695_p12), %s1414_s7, 4294963200  ;;  %p19_p2 = scmp.ge.s32.totalorder %s2241_s16, 4   ;;  %s2752_s18 = smov %s2077_s19 }
 0x2e1   : > { %s2753_s19 = smov %s2081_s20  ;;  %s2754_s20 = smov %s2250_s27 }
 0x2e2   : > { %s2755_s21 = smov %s2241_s16  ;;  %21 = sbr.rel (!%p19_p2) target bundleno = 6 (0x6), region = 93 }
 0x2e9   :  { %1419 = vsyncpa [#allocation3], 1 }
 0x2ea   :  { %1421 = vsyncpa [#allocation3 + $0x1], 1 }
 0x2eb   :  { %1422 = vsyncpa [#allocation6], 1 }
 0x2ec   :  { %1423 = vsyncpa [#allocation4], 1 }
 0x2ed   :  { %1425 = vsyncpa [#allocation4 + $0x1], 1 }

</bundles_post_ra>
